<compile_context>
chip_gen: v7x
topology: tpu7x:2x2x1
jax: 0.10.0
libtpu: 0.0.40
codegen_flags: <defaults>
</compile_context>

<pallas_src>
import jax
import jax.numpy as jnp
from jax.experimental import pallas as pl
from jax.experimental.pallas import tpu as pltpu

HIDDEN = 768          # BERT pooled-output size
FC1 = 512
NUM_CLASSES = 2
OUT_PAD = 128         # lane-dense padded class dimension
TM_MAX = 512          # max batch tile (multiple of 256 for v6e/v7x, 128 for v5e)
NEG_BIG = -1e30       # plain Python float: only used at init time, never traced


def _round_up(x, m):
    return ((x + m - 1) // m) * m


def _choose_tm(B):
    """Pick the batch tile: minimize padding waste, prefer >=2 grid steps."""
    if B <= 128:
        # single tile == full (padded) array; 16-aligned for bf16 sublane packing
        return max(16, _round_up(B, 16))
    best_tm, best_key = None, None
    for tm in (TM_MAX, 256, 128):
        bp = _round_up(B, tm)
        steps = bp // tm
        waste = bp - B
        # prefer >=2 steps (v7x megacore), then minimal padded waste, then larger tile
        key = (0 if steps >= 2 else 1, waste, -tm)
        if best_key is None or key < best_key:
            best_key, best_tm = key, tm
    return best_tm


def head_kernel(x_ref, pw_ref, pb_ref, w1_ref, b1_ref, w2_ref, b2_ref, out_ref):
    # x:  (TM, 768) bf16      pw: (768, 768) bf16   pb: (1, 768) f32
    # w1: (768, 512) bf16     b1: (1, 512) f32
    # w2: (512, 128) bf16     b2: (1, 128) f32      out: (TM, 128) f32

    # --- fused BERT pooler: tanh(pooled @ pool_w + pool_b) ----------------
    cls = jnp.dot(x_ref[...], pw_ref[...],
                  preferred_element_type=jnp.float32) + pb_ref[...]
    cls = jnp.tanh(cls)                                   # f32 EUP (v5e-safe)

    # --- fc1 + ReLU -------------------------------------------------------
    h = jnp.dot(cls.astype(jnp.bfloat16), w1_ref[...],
                preferred_element_type=jnp.float32) + b1_ref[...]
    h = jnp.maximum(h, 0.0)

    # dropout(p=0.1) is identity at inference time (module eval mode)

    # --- fc2 (padded to 128 lanes, lane-dense) ----------------------------
    # Padded weight columns are zero and padded bias lanes are -1e30, so the
    # padded logits are ~-1e30: the plain log-softmax below is already masked
    # to the first NUM_CLASSES lanes with no per-tile iota/where work.
    logits = jnp.dot(h.astype(jnp.bfloat16), w2_ref[...],
                     preferred_element_type=jnp.float32) + b2_ref[...]

    # --- LogSoftmax (dim=1) -------------------------------------------------
    m = jnp.max(logits, axis=1, keepdims=True)
    z = logits - m
    lse = jnp.log(jnp.sum(jnp.exp(z), axis=1, keepdims=True))
    out_ref[...] = z - lse


def classifier_head(pooled, pool_w, pool_b, w1, b1, w2p, b2p):
    B = pooled.shape[0]
    TM = _choose_tm(B)
    Bp = _round_up(B, TM)

    # Stream activations in bf16 (matmul operand dtype) -> ~half the per-step
    # DMA bytes vs. f32; everything else is resident weights.
    x = pooled.astype(jnp.bfloat16)
    if Bp != B:
        x = jnp.pad(x, ((0, Bp - B), (0, 0)))

    out = pl.pallas_call(
        head_kernel,
        out_shape=jax.ShapeDtypeStruct((Bp, OUT_PAD), jnp.float32),
        grid_spec=pltpu.PrefetchScalarGridSpec(
            num_scalar_prefetch=0,
            grid=(Bp // TM,),
            in_specs=[
                pl.BlockSpec((TM, HIDDEN), lambda i: (i, 0)),       # pooled tile (streamed)
                pl.BlockSpec((HIDDEN, HIDDEN), lambda i: (0, 0)),   # pool_w (resident)
                pl.BlockSpec((1, HIDDEN), lambda i: (0, 0)),        # pool_b
                pl.BlockSpec((HIDDEN, FC1), lambda i: (0, 0)),      # w1 (resident)
                pl.BlockSpec((1, FC1), lambda i: (0, 0)),           # b1
                pl.BlockSpec((FC1, OUT_PAD), lambda i: (0, 0)),     # w2 padded (resident)
                pl.BlockSpec((1, OUT_PAD), lambda i: (0, 0)),       # b2 padded (mask in bias)
            ],
            out_specs=pl.BlockSpec((TM, OUT_PAD), lambda i: (i, 0)),
        ),
        compiler_params=pltpu.CompilerParams(
            dimension_semantics=("parallel",),   # megacore sharding on v7x
        ),
    )(x, pool_w, pool_b, w1, b1, w2p, b2p)

    return out[:B, :NUM_CLASSES]


def init_params(key, vocab_size=100):
    ks = jax.random.split(key, 7)

    def unif(k, shape, fan_in):
        bound = 1.0 / jnp.sqrt(fan_in)
        return jax.random.uniform(k, shape, jnp.float32, -bound, bound)

    # fc2 padded to OUT_PAD output lanes: real weights/bias in the first
    # NUM_CLASSES columns, zero weights + -1e30 bias in the padded lanes so the
    # kernel's log-softmax needs no explicit lane mask.
    w2 = unif(ks[5], (FC1, NUM_CLASSES), FC1)
    b2 = unif(ks[6], (1, NUM_CLASSES), FC1)
    w2p = jnp.zeros((FC1, OUT_PAD), jnp.float32).at[:, :NUM_CLASSES].set(w2)
    b2p = jnp.full((1, OUT_PAD), NEG_BIG, jnp.float32).at[:, :NUM_CLASSES].set(b2)

    return {
        # stand-in "BERT" params (deterministic, synthetic)
        "emb":    jax.random.normal(ks[0], (vocab_size, HIDDEN), jnp.float32) * 0.02,
        "pool_w": unif(ks[1], (HIDDEN, HIDDEN), HIDDEN).astype(jnp.bfloat16),
        "pool_b": unif(ks[2], (1, HIDDEN), HIDDEN),
        # classification head (matches nn.Linear(768,512), nn.Linear(512,2))
        "w1": unif(ks[3], (HIDDEN, FC1), HIDDEN).astype(jnp.bfloat16),
        "b1": unif(ks[4], (1, FC1), HIDDEN),
        "w2": w2p.astype(jnp.bfloat16),
        "b2": b2p,
    }


def bert_arch_forward(sent_id, mask, params):
    # TODO(synk): the pretrained 12-layer 'bert-base-cased' encoder has no
    # in-script equivalent; `pooled` is produced by a deterministic stand-in
    # (embedding lookup + mask-weighted mean) in plain JAX glue.  The pooler
    # matmul + tanh and the whole classification head run inside the kernel.
    emb = jnp.take(params["emb"], sent_id, axis=0)            # (B, S, 768)
    m = mask.astype(jnp.float32)[..., None]                   # (B, S, 1)
    pooled = (emb * m).sum(axis=1) / jnp.maximum(m.sum(axis=1), 1.0)   # (B, 768)

    return classifier_head(pooled, params["pool_w"], params["pool_b"],
                           params["w1"], params["b1"],
                           params["w2"], params["b2"])


if __name__ == "__main__":
    key = jax.random.PRNGKey(0)
    k_par, k_ids, k_msk = jax.random.split(key, 3)

    B, S, VOCAB = 8, 16, 100
    params = init_params(k_par, vocab_size=VOCAB)
    sent_id = jax.random.randint(k_ids, (B, S), 0, VOCAB, dtype=jnp.int32)
    mask = (jax.random.uniform(k_msk, (B, S)) > 0.2).astype(jnp.int32)
    mask = mask.at[:, 0].set(1)  # CLS position always attended

    out = bert_arch_forward(sent_id, mask, params)
    out = jax.block_until_ready(out)

    assert out.shape == (B, NUM_CLASSES)
    # rows of log_softmax must exponentiate-sum to 1
    assert bool(jnp.allclose(jnp.exp(out).sum(axis=1), 1.0, atol=1e-4))
    print("KERNEL_OK")
</pallas_src>

<mosaic_0001>
module attributes {stable_mosaic.version = 11 : i64} {
  func.func @head_kernel(%arg0: i32, %arg1: memref<16x768xbf16, #tpu.memory_space<vmem>>, %arg2: memref<768x768xbf16, #tpu.memory_space<vmem>>, %arg3: memref<1x768xf32, #tpu.memory_space<vmem>>, %arg4: memref<768x512xbf16, #tpu.memory_space<vmem>>, %arg5: memref<1x512xf32, #tpu.memory_space<vmem>>, %arg6: memref<512x128xbf16, #tpu.memory_space<vmem>>, %arg7: memref<1x128xf32, #tpu.memory_space<vmem>>, %arg8: memref<16x128xf32, #tpu.memory_space<vmem>>) attributes {dimension_semantics = [#tpu.dimension_semantics<parallel>], iteration_bounds = array<i64: 1>, scalar_prefetch = 0 : i64, scratch_operands = 0 : i64, tpu.core_type = #tpu.core_type<tc>, window_params = [{transform_indices = @transform_0, window_bounds = array<i64: 16, 768>}, {pipeline_mode = #tpu.pipeline_mode<synchronous>, transform_indices = @transform_1, window_bounds = array<i64: 768, 768>}, {pipeline_mode = #tpu.pipeline_mode<synchronous>, transform_indices = @transform_2, window_bounds = array<i64: 1, 768>}, {pipeline_mode = #tpu.pipeline_mode<synchronous>, transform_indices = @transform_3, window_bounds = array<i64: 768, 512>}, {pipeline_mode = #tpu.pipeline_mode<synchronous>, transform_indices = @transform_4, window_bounds = array<i64: 1, 512>}, {pipeline_mode = #tpu.pipeline_mode<synchronous>, transform_indices = @transform_5, window_bounds = array<i64: 512, 128>}, {pipeline_mode = #tpu.pipeline_mode<synchronous>, transform_indices = @transform_6, window_bounds = array<i64: 1, 128>}, {transform_indices = @transform_7, window_bounds = array<i64: 16, 128>}]} {
    %c0 = arith.constant 0 : index
    %c0_0 = arith.constant 0 : index
    %0 = vector.load %arg1[%c0, %c0_0] : memref<16x768xbf16, #tpu.memory_space<vmem>>, vector<16x768xbf16>
    %c0_1 = arith.constant 0 : index
    %c0_2 = arith.constant 0 : index
    %1 = vector.load %arg2[%c0_1, %c0_2] : memref<768x768xbf16, #tpu.memory_space<vmem>>, vector<768x768xbf16>
    %cst = arith.constant dense<0.000000e+00> : vector<16x768xf32>
    %2 = tpu.matmul %0, %1, %cst {dimension_numbers = #tpu.dot_dimension_numbers<[1], [0], [0], [1], [0, 0, 1, 1], [], []>} : vector<16x768xbf16>, vector<768x768xbf16>, vector<16x768xf32> -> vector<16x768xf32>
    %c0_3 = arith.constant 0 : index
    %c0_4 = arith.constant 0 : index
    %3 = vector.load %arg3[%c0_3, %c0_4] : memref<1x768xf32, #tpu.memory_space<vmem>>, vector<1x768xf32>
    %4 = vector.broadcast %3 : vector<1x768xf32> to vector<16x768xf32>
    %5 = arith.addf %2, %4 : vector<16x768xf32>
    %6 = math.tanh %5 : vector<16x768xf32>
    %7 = arith.truncf %6 : vector<16x768xf32> to vector<16x768xbf16>
    %c0_5 = arith.constant 0 : index
    %c0_6 = arith.constant 0 : index
    %8 = vector.load %arg4[%c0_5, %c0_6] : memref<768x512xbf16, #tpu.memory_space<vmem>>, vector<768x512xbf16>
    %cst_7 = arith.constant dense<0.000000e+00> : vector<16x512xf32>
    %9 = tpu.matmul %7, %8, %cst_7 {dimension_numbers = #tpu.dot_dimension_numbers<[1], [0], [0], [1], [0, 0, 1, 1], [], []>} : vector<16x768xbf16>, vector<768x512xbf16>, vector<16x512xf32> -> vector<16x512xf32>
    %c0_8 = arith.constant 0 : index
    %c0_9 = arith.constant 0 : index
    %10 = vector.load %arg5[%c0_8, %c0_9] : memref<1x512xf32, #tpu.memory_space<vmem>>, vector<1x512xf32>
    %11 = vector.broadcast %10 : vector<1x512xf32> to vector<16x512xf32>
    %12 = arith.addf %9, %11 : vector<16x512xf32>
    %cst_10 = arith.constant 0.000000e+00 : f32
    %13 = vector.broadcast %cst_10 : f32 to vector<16x512xf32>
    %14 = arith.maximumf %12, %13 : vector<16x512xf32>
    %15 = arith.truncf %14 : vector<16x512xf32> to vector<16x512xbf16>
    %c0_11 = arith.constant 0 : index
    %c0_12 = arith.constant 0 : index
    %16 = vector.load %arg6[%c0_11, %c0_12] : memref<512x128xbf16, #tpu.memory_space<vmem>>, vector<512x128xbf16>
    %cst_13 = arith.constant dense<0.000000e+00> : vector<16x128xf32>
    %17 = tpu.matmul %15, %16, %cst_13 {dimension_numbers = #tpu.dot_dimension_numbers<[1], [0], [0], [1], [0, 0, 1, 1], [], []>} : vector<16x512xbf16>, vector<512x128xbf16>, vector<16x128xf32> -> vector<16x128xf32>
    %c0_14 = arith.constant 0 : index
    %c0_15 = arith.constant 0 : index
    %18 = vector.load %arg7[%c0_14, %c0_15] : memref<1x128xf32, #tpu.memory_space<vmem>>, vector<1x128xf32>
    %19 = vector.broadcast %18 : vector<1x128xf32> to vector<16x128xf32>
    %20 = arith.addf %17, %19 : vector<16x128xf32>
    %cst_16 = arith.constant dense<0xFF800000> : vector<16xf32>
    %21 = vector.multi_reduction <maximumf>, %20, %cst_16 [1] : vector<16x128xf32> to vector<16xf32>
    %22 = vector.shape_cast %21 : vector<16xf32> to vector<16x1xf32>
    %23 = vector.broadcast %22 : vector<16x1xf32> to vector<16x128xf32>
    %24 = arith.subf %20, %23 : vector<16x128xf32>
    %25 = math.exp %24 : vector<16x128xf32>
    %cst_17 = arith.constant dense<0.000000e+00> : vector<16xf32>
    %26 = vector.multi_reduction <add>, %25, %cst_17 [1] : vector<16x128xf32> to vector<16xf32>
    %27 = vector.shape_cast %26 : vector<16xf32> to vector<16x1xf32>
    %28 = math.log %27 : vector<16x1xf32>
    %29 = vector.broadcast %28 : vector<16x1xf32> to vector<16x128xf32>
    %30 = arith.subf %24, %29 : vector<16x128xf32>
    %c0_18 = arith.constant 0 : index
    %c0_19 = arith.constant 0 : index
    %31 = vector.load %arg8[%c0_18, %c0_19] : memref<16x128xf32, #tpu.memory_space<vmem>>, vector<16x128xf32>
    tpu.vector_store %arg8[%c0_18, %c0_19], %30 {strides = array<i32>} : memref<16x128xf32, #tpu.memory_space<vmem>>, vector<16x128xf32>,
    return
  }
  func.func @transform_0(%arg0: i32) -> (i32, i32) {
    %c0_i32 = arith.constant 0 : i32
    %c0_i32_0 = arith.constant 0 : i32
    return %arg0, %c0_i32 : i32, i32
  }
  func.func @transform_1(%arg0: i32) -> (i32, i32) {
    %c0_i32 = arith.constant 0 : i32
    %c0_i32_0 = arith.constant 0 : i32
    %c0_i32_1 = arith.constant 0 : i32
    return %c0_i32, %c0_i32_0 : i32, i32
  }
  func.func @transform_2(%arg0: i32) -> (i32, i32) {
    %c0_i32 = arith.constant 0 : i32
    %c0_i32_0 = arith.constant 0 : i32
    %c0_i32_1 = arith.constant 0 : i32
    return %c0_i32, %c0_i32_0 : i32, i32
  }
  func.func @transform_3(%arg0: i32) -> (i32, i32) {
    %c0_i32 = arith.constant 0 : i32
    %c0_i32_0 = arith.constant 0 : i32
    %c0_i32_1 = arith.constant 0 : i32
    return %c0_i32, %c0_i32_0 : i32, i32
  }
  func.func @transform_4(%arg0: i32) -> (i32, i32) {
    %c0_i32 = arith.constant 0 : i32
    %c0_i32_0 = arith.constant 0 : i32
    %c0_i32_1 = arith.constant 0 : i32
    return %c0_i32, %c0_i32_0 : i32, i32
  }
  func.func @transform_5(%arg0: i32) -> (i32, i32) {
    %c0_i32 = arith.constant 0 : i32
    %c0_i32_0 = arith.constant 0 : i32
    %c0_i32_1 = arith.constant 0 : i32
    return %c0_i32, %c0_i32_0 : i32, i32
  }
  func.func @transform_6(%arg0: i32) -> (i32, i32) {
    %c0_i32 = arith.constant 0 : i32
    %c0_i32_0 = arith.constant 0 : i32
    %c0_i32_1 = arith.constant 0 : i32
    return %c0_i32, %c0_i32_0 : i32, i32
  }
  func.func @transform_7(%arg0: i32) -> (i32, i32) {
    %c0_i32 = arith.constant 0 : i32
    %c0_i32_0 = arith.constant 0 : i32
    return %arg0, %c0_i32 : i32, i32
  }
}

</mosaic_0001>

<bundles_post_ra>
// kernel: tpu_custom_call.1
= control target key start
LH: loop header
LB: loop body
LE: loop exit
PB: predicated region body
PF: predicated region fallthrough
CT: control target
= control target key end

     0   :  { %12 = vsyncpa [#allocation3], 0  ;;  %s6006_s0 = inlined_call_operand.hbm [shape: bf16[16,768], index: 0, kind: input, shape index: {}]   ;;  %s6007_s1 = inlined_call_operand.hbm [shape: bf16[768,768], index: 1, kind: input, shape index: {}]   ;;  %s6008_s2 = inlined_call_operand.hbm [shape: f32[1,768], index: 2, kind: input, shape index: {}]   ;;  %s6009_s3 = inlined_call_operand.hbm [shape: bf16[768,512], index: 3, kind: input, shape index: {}]   ;;  %s6010_s4 = inlined_call_operand.hbm [shape: f32[1,512], index: 4, kind: input, shape index: {}]   ;;  %s6011_s5 = inlined_call_operand.hbm [shape: bf16[512,128], index: 5, kind: input, shape index: {}]   ;;  %s6012_s6 = inlined_call_operand.hbm [shape: f32[1,128], index: 6, kind: input, shape index: {}]   ;;  %s6013_s7 = inlined_call_operand.hbm [shape: f32[16,128], index: 7, kind: output, shape index: {}]  }
   0x1   :  { %13 = vsyncpa [#allocation6], 0 }
   0x2   :  { %14 = vsyncpa [#allocation9], 0 }
   0x3   :  { %15 = vsyncpa [#allocation12], 0 }
   0x4   :  { %16 = vsyncpa [#allocation4], 0  ;;  %s5771_s24 = smov [#allocation5]   ;;  %s5772_s26 = smov [#allocation8]  }
   0x5   :  { %s34_s25 = sshll.u32 %s5771_s24, 4  ;;  %s56_s27 = sshll.u32 %s5772_s26, 4  ;;  %s35_s25 = int_to_ptr.vmem [resolvable:$true] %s34_s25  ;;  %s5827_s27 = int_to_ptr.vmem [resolvable:$true] %s56_s27 }
   0x6   :  { %s5585_s30 = scalar_lea.hbm %s6007_s1, 36864 }
   0x7   :  { %p5586_p0 = scmp.ne.s32.totalorder %s6007_s1, %s5585_s30  ;;  %p5589_p1 = scmp.lt.u32.totalorder %s5585_s30, %s6007_s1 }
   0x9   :  { %p5591_p2 = pnand %p5589_p1, %p5586_p0 }
   0xb   :  { %5594 = shalt.err (!%p5591_p2)
}
   0xc   :  { %s5595_s12 = scalar_lea.vmem %s35_s25, 36864  ;;  %p5600_p4 = scmp.lt.s32.totalorder %s35_s25, %s35_s25 }
   0xd   :  { %p5596_p3 = scmp.ne.s32.totalorder %s35_s25, %s5595_s12  ;;  %p5601_p5 = scmp.lt.s32.totalorder %s5595_s12, %s5595_s12 }
   0xf   :  { %p5602_p6 = por %p5601_p5, %p5600_p4 }
  0x11   :  { %p5603_p7 = pnand %p5602_p6, %p5596_p3 }
  0x13   :  { %5606 = shalt.err (!%p5603_p7)
}
  0x14   :  { %s5773_s13 = smov 384   ;;  %s5774_s14 = smov 24  }
  0x15   :  { %40 = dma.hbm_to_vmem [thread:$0]  %s6007_s1, 36864, %s35_s25, [#allocation6], %s5773_s13, %s5773_s13, %s5774_s14  }
  0x16   :  { %s5607_s19 = scalar_lea.hbm %s6009_s3, 24576 }
  0x17   :  { %p5608_p8 = scmp.ne.s32.totalorder %s6009_s3, %s5607_s19  ;;  %p5611_p9 = scmp.lt.u32.totalorder %s5607_s19, %s6009_s3 }
  0x19   :  { %p5613_p10 = pnand %p5611_p9, %p5608_p8 }
  0x1b   :  { %5616 = shalt.err (!%p5613_p10)
}
  0x1c   :  { %s5617_s24 = scalar_lea.vmem %s5827_s27, 24576  ;;  %p5622_p12 = scmp.lt.s32.totalorder %s5827_s27, %s5827_s27 }
  0x1d   :  { %p5618_p11 = scmp.ne.s32.totalorder %s5827_s27, %s5617_s24  ;;  %p5623_p13 = scmp.lt.s32.totalorder %s5617_s24, %s5617_s24 }
  0x1f   :  { %p5624_p0 = por %p5623_p13, %p5622_p12 }
  0x21   :  { %p5625_p1 = pnand %p5624_p0, %p5618_p11 }
  0x23   :  { %5628 = shalt.err (!%p5625_p1)
}
  0x24   :  { %s5775_s1 = smov 256   ;;  %s5776_s25 = smov 16  }
  0x25   :  { %62 = dma.hbm_to_vmem [thread:$0]  %s6009_s3, 24576, %s5827_s27, [#allocation9], %s5775_s1, %s5775_s1, %s5776_s25  }
  0x26   :  { %s5777_s29 = smov [#allocation11]   ;;  %s5629_s10 = scalar_lea.hbm %s6011_s5, 4096 }
  0x27   :  { %s78_s30 = sshll.u32 %s5777_s29, 4  ;;  %p5630_p2 = scmp.ne.s32.totalorder %s6011_s5, %s5629_s10  ;;  %s79_s30 = int_to_ptr.vmem [resolvable:$true] %s78_s30 }
  0x28   :  { %p5633_p3 = scmp.lt.u32.totalorder %s5629_s10, %s6011_s5 }
  0x2a   :  { %p5635_p4 = pnand %p5633_p3, %p5630_p2 }
  0x2c   :  { %5638 = shalt.err (!%p5635_p4)
}
  0x2d   :  { %s5639_s17 = scalar_lea.vmem %s79_s30, 4096  ;;  %p5644_p6 = scmp.lt.s32.totalorder %s79_s30, %s79_s30 }
  0x2e   :  { %p5640_p5 = scmp.ne.s32.totalorder %s79_s30, %s5639_s17  ;;  %p5645_p7 = scmp.lt.s32.totalorder %s5639_s17, %s5639_s17 }
  0x30   :  { %p5646_p8 = por %p5645_p7, %p5644_p6 }
  0x32   :  { %p5647_p9 = pnand %p5646_p8, %p5640_p5 }
  0x34   :  { %5650 = shalt.err (!%p5647_p9)
}
  0x35   :  { %s5778_s3 = smov 64   ;;  %s5779_s27 = smov 4  }
  0x36   :  { %84 = dma.hbm_to_vmem [thread:$0]  %s6011_s5, 4096, %s79_s30, [#allocation12], %s5778_s3, %s5778_s3, %s5779_s27  }
  0x37   :  { %s5780_s20 = smov [#allocation2]   ;;  %s5781_s22 = smov [#allocation7]  }
  0x38   :  { %s22_s21 = sshll.u32 %s5780_s20, 4  ;;  %s47_s23 = sshll.u32 %s5781_s22, 4  ;;  %s23_s21 = int_to_ptr.vmem [resolvable:$true] %s22_s21  ;;  %s48_s23 = int_to_ptr.vmem [resolvable:$true] %s47_s23 }
  0x39   :  { %s5651_s25 = scalar_lea.hbm %s6006_s0, 768 }
  0x3a   :  { %p5652_p10 = scmp.ne.s32.totalorder %s6006_s0, %s5651_s25  ;;  %p5655_p11 = scmp.lt.u32.totalorder %s5651_s25, %s6006_s0 }
  0x3c   :  { %p5657_p12 = pnand %p5655_p11, %p5652_p10 }
  0x3e   :  { %5660 = shalt.err (!%p5657_p12)
}
  0x3f   :  { %s5661_s5 = scalar_lea.vmem %s23_s21, 768  ;;  %p5666_p0 = scmp.lt.s32.totalorder %s23_s21, %s23_s21 }
  0x40   :  { %p5662_p13 = scmp.ne.s32.totalorder %s23_s21, %s5661_s5  ;;  %p5667_p1 = scmp.lt.s32.totalorder %s5661_s5, %s5661_s5 }
  0x42   :  { %p5668_p2 = por %p5667_p1, %p5666_p0 }
  0x44   :  { %p5669_p3 = pnand %p5668_p2, %p5662_p13 }
  0x46   :  { %5672 = shalt.err (!%p5669_p3)
}
  0x47   :  { %28 = dma.hbm_to_vmem [thread:$0]  %s6006_s0, 768, %s23_s21, [#allocation3], %s5773_s13, %s5773_s13, %s5774_s14  }
  0x48   :  { %s5673_s12 = scalar_lea.hbm %s6008_s2, 96 }
  0x49   :  { %p5674_p4 = scmp.ne.s32.totalorder %s6008_s2, %s5673_s12  ;;  %p5677_p5 = scmp.lt.u32.totalorder %s5673_s12, %s6008_s2 }
  0x4b   :  { %p5679_p6 = pnand %p5677_p5, %p5674_p4 }
  0x4d   :  { %5682 = shalt.err (!%p5679_p6)
}
  0x4e   :  { %s5683_s27 = scalar_lea.vmem %s48_s23, 96  ;;  %p5688_p8 = scmp.lt.s32.totalorder %s48_s23, %s48_s23 }
  0x4f   :  { %p5684_p7 = scmp.ne.s32.totalorder %s48_s23, %s5683_s27  ;;  %p5689_p9 = scmp.lt.s32.totalorder %s5683_s27, %s5683_s27 }
  0x51   :  { %p5690_p10 = por %p5689_p9, %p5688_p8 }
  0x53   :  { %p5691_p11 = pnand %p5690_p10, %p5684_p7 }
  0x55   :  { %5694 = shalt.err (!%p5691_p11)
}
  0x56   :  { %50 = dma.hbm_to_vmem [thread:$0]  %s6008_s2, 96, %s48_s23, [#allocation6]  }
  0x57   :  { %s5782_s14 = smov [#allocation10]   ;;  %s5783_s19 = smov [#allocation13]  }
  0x58   :  { %s69_s18 = sshll.u32 %s5782_s14, 4  ;;  %s91_s20 = sshll.u32 %s5783_s19, 4  ;;  %s70_s18 = int_to_ptr.vmem [resolvable:$true] %s69_s18  ;;  %s92_s20 = int_to_ptr.vmem [resolvable:$true] %s91_s20 }
  0x59   :  { %s5695_s24 = scalar_lea.hbm %s6010_s4, 64 }
  0x5a   :  { %p5696_p12 = scmp.ne.s32.totalorder %s6010_s4, %s5695_s24  ;;  %p5699_p13 = scmp.lt.u32.totalorder %s5695_s24, %s6010_s4 }
  0x5c   :  { %p5701_p0 = pnand %p5699_p13, %p5696_p12 }
  0x5e   :  { %5704 = shalt.err (!%p5701_p0)
}
  0x5f   :  { %s5705_s2 = scalar_lea.vmem %s70_s18, 64  ;;  %p5710_p2 = scmp.lt.s32.totalorder %s70_s18, %s70_s18 }
  0x60   :  { %p5706_p1 = scmp.ne.s32.totalorder %s70_s18, %s5705_s2  ;;  %p5711_p3 = scmp.lt.s32.totalorder %s5705_s2, %s5705_s2 }
  0x62   :  { %p5712_p4 = por %p5711_p3, %p5710_p2 }
  0x64   :  { %p5713_p5 = pnand %p5712_p4, %p5706_p1 }
  0x66   :  { %5716 = shalt.err (!%p5713_p5)
}
  0x67   :  { %72 = dma.hbm_to_vmem [thread:$0]  %s6010_s4, 64, %s70_s18, [#allocation9]  }
  0x68   :  { %s5717_s30 = scalar_lea.hbm %s6012_s6, 16 }
  0x69   :  { %p5718_p6 = scmp.ne.s32.totalorder %s6012_s6, %s5717_s30  ;;  %p5721_p7 = scmp.lt.u32.totalorder %s5717_s30, %s6012_s6 }
  0x6b   :  { %p5723_p8 = pnand %p5721_p7, %p5718_p6 }
  0x6d   :  { %5726 = shalt.err (!%p5723_p8)
}
  0x6e   :  { %s5727_s15 = scalar_lea.vmem %s92_s20, 16  ;;  %s5731_s16 = scalar_lea.vmem %s92_s20, 32 }
  0x6f   :  { %p5728_p9 = scmp.ne.s32.totalorder %s92_s20, %s5727_s15  ;;  %p5732_p10 = scmp.lt.s32.totalorder %s92_s20, %s92_s20 }
  0x70   :  { %p5733_p11 = scmp.lt.s32.totalorder %s5731_s16, %s5727_s15 }
  0x72   :  { %p5734_p12 = por %p5733_p11, %p5732_p10 }
  0x74   :  { %p5735_p13 = pnand %p5734_p12, %p5728_p9 }
  0x76   :  { %5738 = shalt.err (!%p5735_p13)
}
  0x77   :  { %94 = dma.hbm_to_vmem [thread:$0]  %s6012_s6, 16, %s92_s20, [#allocation12]  }
  0x78   :  { %5761 = dma.done.wait [#allocation3], 768  }
  0x79   :  { %5762 = vsyncadd [#allocation3], 4294966528 }
  0x7a   :  { %5763 = dma.done.wait [#allocation6], 36960  }
  0x7b   :  { %5764 = vsyncadd [#allocation6], 4294930336 }
  0x7c   :  { %5765 = dma.done.wait [#allocation9], 24640  }
  0x7d   :  { %5766 = vsyncadd [#allocation9], 4294942656 }
  0x7e   :  { %5767 = dma.done.wait [#allocation12], 4112  }
  0x7f   :  { %5768 = vsyncadd [#allocation12], 4294963184  ;;  %v4788_v0 = vld [vmem:[#allocation5 + $0x4] ss:$24 sps:$4 sm:$0xff]   ;;  %v4792_v2 = vld [vmem:[#allocation5] ss:$24 sps:$4 sm:$0xff]  }
  0x80   :  { %v4790_v1 = vld [vmem:[#allocation5 + $0x304] ss:$24 sps:$4 sm:$0xff]   ;;  %1913 = vmatprep.subr.bf16.mxu1 %v4788_v0  ;;  %v4793_v3 = vld [vmem:[#allocation5 + $0x300] ss:$24 sps:$4 sm:$0xff]   ;;  %v4794_v4 = vld [vmem:[#allocation5 + $0x34] ss:$24 sps:$4 sm:$0xff]  }
  0x81   :  { %1956 = vmatprep.subr.bf16.mxu0 %v4790_v1  ;;  %1914 = vmatpush1.bf16.msra.mxu1 %v4792_v2  ;;  %v4796_v5 = vld [vmem:[#allocation5 + $0x334] ss:$24 sps:$4 sm:$0xff]   ;;  %v4798_v6 = vld [vmem:[#allocation5 + $0x30] ss:$24 sps:$4 sm:$0xff]   ;;  %v4800_v8 = vld [vmem:[#allocation5 + $0x64] ss:$24 sps:$4 sm:$0xff]  }
  0x82   :  { %1957 = vmatpush1.bf16.msra.mxu0 %v4793_v3  ;;  %1915 = vmatprep.subr.bf16.mxu1 %v4794_v4  ;;  %v4799_v7 = vld [vmem:[#allocation5 + $0x330] ss:$24 sps:$4 sm:$0xff]   ;;  %v4802_v9 = vld [vmem:[#allocation5 + $0x364] ss:$24 sps:$4 sm:$0xff]   ;;  %v4804_v10 = vld [vmem:[#allocation5 + $0x60] ss:$24 sps:$4 sm:$0xff]  }
  0x83   :  { %1958 = vmatprep.subr.bf16.mxu0 %v4796_v5  ;;  %v4805_v11 = vld [vmem:[#allocation5 + $0x360] ss:$24 sps:$4 sm:$0xff]   ;;  %v4806_v12 = vld [vmem:[#allocation5 + $0x94] ss:$24 sps:$4 sm:$0xff]   ;;  %v4810_v14 = vld [vmem:[#allocation5 + $0x90] ss:$24 sps:$4 sm:$0xff]  }
  0x84   :  { %v4808_v13 = vld [vmem:[#allocation5 + $0x394] ss:$24 sps:$4 sm:$0xff]   ;;  %v4811_v15 = vld [vmem:[#allocation5 + $0x390] ss:$24 sps:$4 sm:$0xff]   ;;  %v4812_v16 = vld [vmem:[#allocation5 + $0xc4] ss:$24 sps:$4 sm:$0xff]  }
  0x85   :  { %1916 = vmatpush1.bf16.msra.mxu1 %v4798_v6  ;;  %v4814_v17 = vld [vmem:[#allocation5 + $0x3c4] ss:$24 sps:$4 sm:$0xff]   ;;  %v4816_v18 = vld [vmem:[#allocation5 + $0xc0] ss:$24 sps:$4 sm:$0xff]   ;;  %v4818_v20 = vld [vmem:[#allocation5 + $0xf4] ss:$24 sps:$4 sm:$0xff]  }
  0x86   :  { %1959 = vmatpush1.bf16.msra.mxu0 %v4799_v7  ;;  %1917 = vmatprep.subr.bf16.mxu1 %v4800_v8  ;;  %v4817_v19 = vld [vmem:[#allocation5 + $0x3c0] ss:$24 sps:$4 sm:$0xff]   ;;  %v4820_v21 = vld [vmem:[#allocation5 + $0x3f4] ss:$24 sps:$4 sm:$0xff]   ;;  %v4822_v22 = vld [vmem:[#allocation5 + $0xf0] ss:$24 sps:$4 sm:$0xff]  }
  0x87   :  { %1960 = vmatprep.subr.bf16.mxu0 %v4802_v9  ;;  %v4823_v23 = vld [vmem:[#allocation5 + $0x3f0] ss:$24 sps:$4 sm:$0xff]   ;;  %v4824_v24 = vld [vmem:[#allocation5 + $0x124] ss:$24 sps:$4 sm:$0xff]   ;;  %v4828_v26 = vld [vmem:[#allocation5 + $0x120] ss:$24 sps:$4 sm:$0xff]  }
  0x88   :  { %v4826_v25 = vld [vmem:[#allocation5 + $0x424] ss:$24 sps:$4 sm:$0xff]   ;;  %v4829_v27 = vld [vmem:[#allocation5 + $0x420] ss:$24 sps:$4 sm:$0xff]   ;;  %v4830_v28 = vld [vmem:[#allocation5 + $0x154] ss:$24 sps:$4 sm:$0xff]  }
  0x89   :  { %1918 = vmatpush1.bf16.msra.mxu1 %v4804_v10  ;;  %v4832_v29 = vld [vmem:[#allocation5 + $0x454] ss:$24 sps:$4 sm:$0xff]   ;;  %v4834_v30 = vld [vmem:[#allocation5 + $0x150] ss:$24 sps:$4 sm:$0xff]   ;;  %v4836_v32 = vld [vmem:[#allocation5 + $0x184] ss:$24 sps:$4 sm:$0xff]  }
  0x8a   :  { %1961 = vmatpush1.bf16.msra.mxu0 %v4805_v11  ;;  %1919 = vmatprep.subr.bf16.mxu1 %v4806_v12  ;;  %v4835_v31 = vld [vmem:[#allocation5 + $0x450] ss:$24 sps:$4 sm:$0xff]   ;;  %v4838_v33 = vld [vmem:[#allocation5 + $0x484] ss:$24 sps:$4 sm:$0xff]   ;;  %v4840_v34 = vld [vmem:[#allocation5 + $0x180] ss:$24 sps:$4 sm:$0xff]  }
  0x8b   :  { %1962 = vmatprep.subr.bf16.mxu0 %v4808_v13  ;;  %v4841_v35 = vld [vmem:[#allocation5 + $0x480] ss:$24 sps:$4 sm:$0xff]   ;;  %v4842_v36 = vld [vmem:[#allocation5 + $0x1b4] ss:$24 sps:$4 sm:$0xff]   ;;  %v4846_v38 = vld [vmem:[#allocation5 + $0x1b0] ss:$24 sps:$4 sm:$0xff]  }
  0x8c   :  { %v4844_v37 = vld [vmem:[#allocation5 + $0x4b4] ss:$24 sps:$4 sm:$0xff]   ;;  %v4847_v39 = vld [vmem:[#allocation5 + $0x4b0] ss:$24 sps:$4 sm:$0xff]   ;;  %v4848_v40 = vld [vmem:[#allocation5 + $0x1e4] ss:$24 sps:$4 sm:$0xff]  }
  0x8d   :  { %1920 = vmatpush1.bf16.msra.mxu1 %v4810_v14  ;;  %v4850_v41 = vld [vmem:[#allocation5 + $0x4e4] ss:$24 sps:$4 sm:$0xff]   ;;  %v4852_v42 = vld [vmem:[#allocation5 + $0x1e0] ss:$24 sps:$4 sm:$0xff]   ;;  %v4854_v44 = vld [vmem:[#allocation5 + $0x214] ss:$24 sps:$4 sm:$0xff]  }
  0x8e   :  { %1963 = vmatpush1.bf16.msra.mxu0 %v4811_v15  ;;  %1921 = vmatprep.subr.bf16.mxu1 %v4812_v16  ;;  %v4853_v43 = vld [vmem:[#allocation5 + $0x4e0] ss:$24 sps:$4 sm:$0xff]   ;;  %v4856_v45 = vld [vmem:[#allocation5 + $0x514] ss:$24 sps:$4 sm:$0xff]   ;;  %v4858_v46 = vld [vmem:[#allocation5 + $0x210] ss:$24 sps:$4 sm:$0xff]  }
  0x8f   :  { %1964 = vmatprep.subr.bf16.mxu0 %v4814_v17  ;;  %v4859_v47 = vld [vmem:[#allocation5 + $0x510] ss:$24 sps:$4 sm:$0xff]   ;;  %v4860_v48 = vld [vmem:[#allocation5 + $0x244] ss:$24 sps:$4 sm:$0xff]   ;;  %v5924_v49 = vld [vmem:[#allocation2 + $0x4] ss:$24 sps:$4 sm:$0xff]  }
  0x90   :  { %v5926_v50 = vld [vmem:[#allocation2 + $0xc] ss:$24 sps:$4 sm:$0xff]   ;;  %1945 = vmatprep.mubr.bf16.mxu1 %v5924_v49  ;;  %v4864_v52 = vld [vmem:[#allocation5 + $0x240] ss:$24 sps:$4 sm:$0xff]   ;;  %v4870_v56 = vld [vmem:[#allocation5 + $0x270] ss:$24 sps:$4 sm:$0xff]  }
  0x91   :  { %1922 = vmatpush1.bf16.msra.mxu1 %v4816_v18  ;;  %v4862_v51 = vld [vmem:[#allocation5 + $0x544] ss:$24 sps:$4 sm:$0xff]   ;;  %1988 = vmatprep.mubr.bf16.mxu0 %v5926_v50  ;;  %v4865_v53 = vld [vmem:[#allocation5 + $0x540] ss:$24 sps:$4 sm:$0xff]   ;;  %v4866_v54 = vld [vmem:[#allocation5 + $0x274] ss:$24 sps:$4 sm:$0xff]  }
  0x92   :  { %1965 = vmatpush1.bf16.msra.mxu0 %v4817_v19  ;;  %1923 = vmatprep.subr.bf16.mxu1 %v4818_v20  ;;  %v4868_v55 = vld [vmem:[#allocation5 + $0x574] ss:$24 sps:$4 sm:$0xff]   ;;  %v4871_v57 = vld [vmem:[#allocation5 + $0x570] ss:$24 sps:$4 sm:$0xff]   ;;  %v4872_v58 = vld [vmem:[#allocation5 + $0x2a4] ss:$24 sps:$4 sm:$0xff]  }
  0x93   :  { %1966 = vmatprep.subr.bf16.mxu0 %v4820_v21  ;;  %v4874_v59 = vld [vmem:[#allocation5 + $0x5a4] ss:$24 sps:$4 sm:$0xff]   ;;  %v4876_v60 = vld [vmem:[#allocation5 + $0x2a0] ss:$24 sps:$4 sm:$0xff]   ;;  %v4878_v62 = vld [vmem:[#allocation5 + $0x2d4] ss:$24 sps:$4 sm:$0xff]  }
  0x94   :  { %v4877_v61 = vld [vmem:[#allocation5 + $0x5a0] ss:$24 sps:$4 sm:$0xff]   ;;  %v4880_v63 = vld [vmem:[#allocation5 + $0x5d4] ss:$24 sps:$4 sm:$0xff]   ;;  %v4882_v0 = vld [vmem:[#allocation5 + $0x2d0] ss:$24 sps:$4 sm:$0xff]  }
  0x95   :  { %1924 = vmatpush1.bf16.msra.mxu1 %v4822_v22  ;;  %v4883_v1 = vld [vmem:[#allocation5 + $0x5d0] ss:$24 sps:$4 sm:$0xff]   ;;  %v4891_v2 = vld [vmem:[#allocation5 + $0x604] ss:$24 sps:$4 sm:$0xff]   ;;  %v4889_v5 = vld [vmem:[#allocation5 + $0x600] ss:$24 sps:$4 sm:$0xff]  }
  0x96   :  { %1967 = vmatpush1.bf16.msra.mxu0 %v4823_v23  ;;  %1925 = vmatprep.subr.bf16.mxu1 %v4824_v24  ;;  %v4894_v3 = vld [vmem:[#allocation5 + $0xc] ss:$24 sps:$4 sm:$0xff]   ;;  %v5930_v4 = vld [vmem:[#allocation2] ss:$24 sps:$4 sm:$0xff]   ;;  %v4901_v9 = vld [vmem:[#allocation5 + $0x3c] ss:$24 sps:$4 sm:$0xff]  }
  0x97   :  { %1968 = vmatprep.subr.bf16.mxu0 %v4826_v25  ;;  %v4892_v6 = vld [vmem:[#allocation5 + $0x8] ss:$24 sps:$4 sm:$0xff]   ;;  %v5932_v7 = vld [vmem:[#allocation2 + $0x8] ss:$24 sps:$4 sm:$0xff]   ;;  %v4898_v8 = vld [vmem:[#allocation5 + $0x634] ss:$24 sps:$4 sm:$0xff]  }
  0x98   :  { %v4896_v10 = vld [vmem:[#allocation5 + $0x630] ss:$24 sps:$4 sm:$0xff]   ;;  %v4904_v12 = vld [vmem:[#allocation5 + $0x664] ss:$24 sps:$4 sm:$0xff]   ;;  %v4902_v14 = vld [vmem:[#allocation5 + $0x660] ss:$24 sps:$4 sm:$0xff]  }
  0x99   :  { %1926 = vmatpush1.bf16.msra.mxu1 %v4828_v26  ;;  %v4899_v11 = vld [vmem:[#allocation5 + $0x38] ss:$24 sps:$4 sm:$0xff]   ;;  %v4907_v13 = vld [vmem:[#allocation5 + $0x6c] ss:$24 sps:$4 sm:$0xff]   ;;  %v4905_v15 = vld [vmem:[#allocation5 + $0x68] ss:$24 sps:$4 sm:$0xff]  }
  0x9a   :  { %1969 = vmatpush1.bf16.msra.mxu0 %v4829_v27  ;;  %1927 = vmatprep.subr.bf16.mxu1 %v4830_v28  ;;  %v4910_v16 = vld [vmem:[#allocation5 + $0x694] ss:$24 sps:$4 sm:$0xff]   ;;  %v4908_v18 = vld [vmem:[#allocation5 + $0x690] ss:$24 sps:$4 sm:$0xff]   ;;  %v4916_v20 = vld [vmem:[#allocation5 + $0x6c4] ss:$24 sps:$4 sm:$0xff]  }
  0x9b   :  { %1970 = vmatprep.subr.bf16.mxu0 %v4832_v29  ;;  %v4913_v17 = vld [vmem:[#allocation5 + $0x9c] ss:$24 sps:$4 sm:$0xff]   ;;  %v4911_v19 = vld [vmem:[#allocation5 + $0x98] ss:$24 sps:$4 sm:$0xff]   ;;  %v4919_v21 = vld [vmem:[#allocation5 + $0xcc] ss:$24 sps:$4 sm:$0xff]  }
  0x9c   :  { %v4914_v22 = vld [vmem:[#allocation5 + $0x6c0] ss:$24 sps:$4 sm:$0xff]   ;;  %v4922_v24 = vld [vmem:[#allocation5 + $0x6f4] ss:$24 sps:$4 sm:$0xff]   ;;  %v4920_v26 = vld [vmem:[#allocation5 + $0x6f0] ss:$24 sps:$4 sm:$0xff]  }
  0x9d   :  { %1928 = vmatpush1.bf16.msra.mxu1 %v4834_v30  ;;  %v4917_v23 = vld [vmem:[#allocation5 + $0xc8] ss:$24 sps:$4 sm:$0xff]   ;;  %v4925_v25 = vld [vmem:[#allocation5 + $0xfc] ss:$24 sps:$4 sm:$0xff]   ;;  %v4923_v27 = vld [vmem:[#allocation5 + $0xf8] ss:$24 sps:$4 sm:$0xff]  }
  0x9e   :  { %1971 = vmatpush1.bf16.msra.mxu0 %v4835_v31  ;;  %1929 = vmatprep.subr.bf16.mxu1 %v4836_v32  ;;  %v4928_v28 = vld [vmem:[#allocation5 + $0x724] ss:$24 sps:$4 sm:$0xff]   ;;  %v4926_v30 = vld [vmem:[#allocation5 + $0x720] ss:$24 sps:$4 sm:$0xff]   ;;  %v4934_v32 = vld [vmem:[#allocation5 + $0x754] ss:$24 sps:$4 sm:$0xff]  }
  0x9f   :  { %1972 = vmatprep.subr.bf16.mxu0 %v4838_v33  ;;  %v4931_v29 = vld [vmem:[#allocation5 + $0x12c] ss:$24 sps:$4 sm:$0xff]   ;;  %v4929_v31 = vld [vmem:[#allocation5 + $0x128] ss:$24 sps:$4 sm:$0xff]   ;;  %v4937_v33 = vld [vmem:[#allocation5 + $0x15c] ss:$24 sps:$4 sm:$0xff]  }
  0xa0   :  { %s5784_s6 = smov [#allocation14]  }
  0xa1   :  { %1930 = vmatpush1.bf16.msra.mxu1 %v4840_v34  ;;  %v5937_v34 = vld [vmem:[#allocation2 + $0x14] ss:$24 sps:$4 sm:$0xff]   ;;  %s4134_s3 = sshll.u32 %s5784_s6, 4  ;;  %s4135_s3 = int_to_ptr.vmem [resolvable:$true] %s4134_s3 }
  0xa2   :  { %1973 = vmatpush1.bf16.msra.mxu0 %v4841_v35  ;;  %1931 = vmatprep.subr.bf16.mxu1 %v4842_v36  ;;  %v4932_v35 = vld [vmem:[#allocation5 + $0x750] ss:$24 sps:$4 sm:$0xff]   ;;  %s5739_s27 = scalar_lea.vmem %s4135_s3, 256  ;;  %p5744_p1 = scmp.lt.s32.totalorder %s4135_s3, %s4135_s3 }
  0xa3   :  { %1974 = vmatprep.subr.bf16.mxu0 %v4844_v37  ;;  %v4935_v36 = vld [vmem:[#allocation5 + $0x158] ss:$24 sps:$4 sm:$0xff]   ;;  %v4940_v37 = vld [vmem:[#allocation5 + $0x784] ss:$24 sps:$4 sm:$0xff]   ;;  %p5740_p0 = scmp.ne.s32.totalorder %s4135_s3, %s5739_s27  ;;  %p5745_p2 = scmp.lt.s32.totalorder %s5739_s27, %s5739_s27 }
  0xa5   :  { %1932 = vmatpush1.bf16.msra.mxu1 %v4846_v38  ;;  %v4943_v38 = vld [vmem:[#allocation5 + $0x18c] ss:$24 sps:$4 sm:$0xff]   ;;  %p5746_p3 = por %p5745_p2, %p5744_p1 }
  0xa6   :  { %1975 = vmatpush1.bf16.msra.mxu0 %v4847_v39  ;;  %1933 = vmatprep.subr.bf16.mxu1 %v4848_v40  ;;  %v4938_v39 = vld [vmem:[#allocation5 + $0x780] ss:$24 sps:$4 sm:$0xff]  }
  0xa7   :  { %1976 = vmatprep.subr.bf16.mxu0 %v4850_v41  ;;  %v4941_v40 = vld [vmem:[#allocation5 + $0x188] ss:$24 sps:$4 sm:$0xff]   ;;  %v4946_v41 = vld [vmem:[#allocation5 + $0x7b4] ss:$24 sps:$4 sm:$0xff]   ;;  %p5747_p4 = pnand %p5746_p3, %p5740_p0 }
  0xa9   :  { %1934 = vmatpush1.bf16.msra.mxu1 %v4852_v42  ;;  %v4949_v42 = vld [vmem:[#allocation5 + $0x1bc] ss:$24 sps:$4 sm:$0xff]  }
  0xaa   :  { %1977 = vmatpush1.bf16.msra.mxu0 %v4853_v43  ;;  %1935 = vmatprep.subr.bf16.mxu1 %v4854_v44  ;;  %v4944_v43 = vld [vmem:[#allocation5 + $0x7b0] ss:$24 sps:$4 sm:$0xff]  }
  0xab   :  { %1978 = vmatprep.subr.bf16.mxu0 %v4856_v45  ;;  %v4947_v44 = vld [vmem:[#allocation5 + $0x1b8] ss:$24 sps:$4 sm:$0xff]   ;;  %v4952_v45 = vld [vmem:[#allocation5 + $0x7e4] ss:$24 sps:$4 sm:$0xff]  }
  0xad   :  { %1936 = vmatpush1.bf16.msra.mxu1 %v4858_v46  ;;  %v4955_v46 = vld [vmem:[#allocation5 + $0x1ec] ss:$24 sps:$4 sm:$0xff]  }
  0xae   :  { %1979 = vmatpush1.bf16.msra.mxu0 %v4859_v47  ;;  %1937 = vmatprep.subr.bf16.mxu1 %v4860_v48  ;;  %v4950_v47 = vld [vmem:[#allocation5 + $0x7e0] ss:$24 sps:$4 sm:$0xff]  }
  0xaf   :  { %1980 = vmatprep.subr.bf16.mxu0 %v4862_v51  ;;  %v4953_v48 = vld [vmem:[#allocation5 + $0x1e8] ss:$24 sps:$4 sm:$0xff]   ;;  %v4958_v51 = vld [vmem:[#allocation5 + $0x814] ss:$24 sps:$4 sm:$0xff]  }
  0xb1   :  { %1938 = vmatpush1.bf16.msra.mxu1 %v4864_v52  ;;  %v4961_v52 = vld [vmem:[#allocation5 + $0x21c] ss:$24 sps:$4 sm:$0xff]  }
  0xb2   :  { %1981 = vmatpush1.bf16.msra.mxu0 %v4865_v53  ;;  %1939 = vmatprep.subr.bf16.mxu1 %v4866_v54  ;;  %v4956_v53 = vld [vmem:[#allocation5 + $0x810] ss:$24 sps:$4 sm:$0xff]  }
  0xb3   :  { %1982 = vmatprep.subr.bf16.mxu0 %v4868_v55  ;;  %v4959_v54 = vld [vmem:[#allocation5 + $0x218] ss:$24 sps:$4 sm:$0xff]   ;;  %v4964_v55 = vld [vmem:[#allocation5 + $0x844] ss:$24 sps:$4 sm:$0xff]  }
  0xb5   :  { %1940 = vmatpush1.bf16.msra.mxu1 %v4870_v56  ;;  %v4967_v56 = vld [vmem:[#allocation5 + $0x24c] ss:$24 sps:$4 sm:$0xff]  }
  0xb6   :  { %1983 = vmatpush1.bf16.msra.mxu0 %v4871_v57  ;;  %1941 = vmatprep.subr.bf16.mxu1 %v4872_v58  ;;  %v4962_v57 = vld [vmem:[#allocation5 + $0x840] ss:$24 sps:$4 sm:$0xff]  }
  0xb7   :  { %1984 = vmatprep.subr.bf16.mxu0 %v4874_v59  ;;  %v4965_v58 = vld [vmem:[#allocation5 + $0x248] ss:$24 sps:$4 sm:$0xff]   ;;  %v4970_v59 = vld [vmem:[#allocation5 + $0x874] ss:$24 sps:$4 sm:$0xff]  }
  0xb9   :  { %1942 = vmatpush1.bf16.msra.mxu1 %v4876_v60  ;;  %v4973_v60 = vld [vmem:[#allocation5 + $0x27c] ss:$24 sps:$4 sm:$0xff]  }
  0xba   :  { %1985 = vmatpush1.bf16.msra.mxu0 %v4877_v61  ;;  %1943 = vmatprep.subr.bf16.mxu1 %v4878_v62  ;;  %v4968_v61 = vld [vmem:[#allocation5 + $0x870] ss:$24 sps:$4 sm:$0xff]  }
  0xbb   :  { %1986 = vmatprep.subr.bf16.mxu0 %v4880_v63  ;;  %v4971_v62 = vld [vmem:[#allocation5 + $0x278] ss:$24 sps:$4 sm:$0xff]   ;;  %v4976_v63 = vld [vmem:[#allocation5 + $0x8a4] ss:$24 sps:$4 sm:$0xff]  }
  0xbd   :  { %1944 = vmatpush1.bf16.msra.mxu1 %v4882_v0  ;;  %v4979_v0 = vld [vmem:[#allocation5 + $0x2ac] ss:$24 sps:$4 sm:$0xff]  }
  0xbe   :  { %1987 = vmatpush1.bf16.msra.mxu0 %v4883_v1  ;;  %2042 = vmatprep.subr.bf16.mxu1 %v4894_v3  ;;  %v4974_v1 = vld [vmem:[#allocation5 + $0x8a0] ss:$24 sps:$4 sm:$0xff]   ;;  %v4982_v3 = vld [vmem:[#allocation5 + $0x8d4] ss:$24 sps:$4 sm:$0xff]  }
  0xbf   :  { %1999 = vmatprep.subr.bf16.mxu0 %v4891_v2  ;;  %v4977_v2 = vld [vmem:[#allocation5 + $0x2a8] ss:$24 sps:$4 sm:$0xff]  }
  0xc0   :  { %1946 = vmatmul.mubr.bf16.vlgmr.msra.gmra.mrb[0].mxu1 %v5930_v4 }
  0xc1   :  { %1989 = vmatmul.mubr.bf16.vlgmr.msra.gmra.mrb[0].mxu0 %v5932_v7  ;;  %2043 = vmatpush1.bf16.msra.mxu1 %v4892_v6  ;;  %v4980_v6 = vld [vmem:[#allocation5 + $0x8d0] ss:$24 sps:$4 sm:$0xff]  }
  0xc2   :  { %2000 = vmatpush1.bf16.msra.mxu0 %v4889_v5  ;;  %2044 = vmatprep.subr.bf16.mxu1 %v4901_v9  ;;  %v4985_v5 = vld [vmem:[#allocation5 + $0x2dc] ss:$24 sps:$4 sm:$0xff]   ;;  %v4991_v9 = vld [vmem:[#allocation5 + $0x30c] ss:$24 sps:$4 sm:$0xff]  }
  0xc3   :  { %2001 = vmatprep.subr.bf16.mxu0 %v4898_v8  ;;  %2074 = vmatprep.mubr.bf16.mxu1 %v5924_v49  ;;  %v4983_v8 = vld [vmem:[#allocation5 + $0x2d8] ss:$24 sps:$4 sm:$0xff]  }
  0xc4   :  { %2031 = vmatprep.mubr.bf16.mxu0 %v5937_v34 }
  0xc5   :  { %2045 = vmatpush1.bf16.msra.mxu1 %v4899_v11  ;;  %v5940_v11 = vld [vmem:[#allocation2 + $0x10] ss:$24 sps:$4 sm:$0xff]  }
  0xc6   :  { %2002 = vmatpush1.bf16.msra.mxu0 %v4896_v10  ;;  %2046 = vmatprep.subr.bf16.mxu1 %v4907_v13  ;;  %v4994_v10 = vld [vmem:[#allocation5 + $0x14] ss:$24 sps:$4 sm:$0xff]   ;;  %v4992_v13 = vld [vmem:[#allocation5 + $0x10] ss:$24 sps:$4 sm:$0xff]  }
  0xc7   :  { %2003 = vmatprep.subr.bf16.mxu0 %v4904_v12  ;;  %v4989_v12 = vld [vmem:[#allocation5 + $0x308] ss:$24 sps:$4 sm:$0xff]  }
  0xc9   :  { %2047 = vmatpush1.bf16.msra.mxu1 %v4905_v15  ;;  %v5000_v15 = vld [vmem:[#allocation5 + $0x44] ss:$24 sps:$4 sm:$0xff]  }
  0xca   :  { %2004 = vmatpush1.bf16.msra.mxu0 %v4902_v14  ;;  %2048 = vmatprep.subr.bf16.mxu1 %v4913_v17  ;;  %v4997_v14 = vld [vmem:[#allocation5 + $0x33c] ss:$24 sps:$4 sm:$0xff]   ;;  %v4998_v17 = vld [vmem:[#allocation5 + $0x40] ss:$24 sps:$4 sm:$0xff]  }
  0xcb   :  { %2005 = vmatprep.subr.bf16.mxu0 %v4910_v16  ;;  %v4995_v16 = vld [vmem:[#allocation5 + $0x338] ss:$24 sps:$4 sm:$0xff]  }
  0xcd   :  { %2049 = vmatpush1.bf16.msra.mxu1 %v4911_v19  ;;  %v5006_v19 = vld [vmem:[#allocation5 + $0x74] ss:$24 sps:$4 sm:$0xff]  }
  0xce   :  { %2006 = vmatpush1.bf16.msra.mxu0 %v4908_v18  ;;  %2050 = vmatprep.subr.bf16.mxu1 %v4919_v21  ;;  %v5003_v18 = vld [vmem:[#allocation5 + $0x36c] ss:$24 sps:$4 sm:$0xff]   ;;  %v5004_v21 = vld [vmem:[#allocation5 + $0x70] ss:$24 sps:$4 sm:$0xff]  }
  0xcf   :  { %2007 = vmatprep.subr.bf16.mxu0 %v4916_v20  ;;  %v5001_v20 = vld [vmem:[#allocation5 + $0x368] ss:$24 sps:$4 sm:$0xff]  }
  0xd1   :  { %2051 = vmatpush1.bf16.msra.mxu1 %v4917_v23  ;;  %v5012_v23 = vld [vmem:[#allocation5 + $0xa4] ss:$24 sps:$4 sm:$0xff]  }
  0xd2   :  { %2008 = vmatpush1.bf16.msra.mxu0 %v4914_v22  ;;  %2052 = vmatprep.subr.bf16.mxu1 %v4925_v25  ;;  %v5009_v22 = vld [vmem:[#allocation5 + $0x39c] ss:$24 sps:$4 sm:$0xff]   ;;  %v5010_v25 = vld [vmem:[#allocation5 + $0xa0] ss:$24 sps:$4 sm:$0xff]  }
  0xd3   :  { %2009 = vmatprep.subr.bf16.mxu0 %v4922_v24  ;;  %v5007_v24 = vld [vmem:[#allocation5 + $0x398] ss:$24 sps:$4 sm:$0xff]  }
  0xd5   :  { %2053 = vmatpush1.bf16.msra.mxu1 %v4923_v27  ;;  %v5018_v27 = vld [vmem:[#allocation5 + $0xd4] ss:$24 sps:$4 sm:$0xff]  }
  0xd6   :  { %2010 = vmatpush1.bf16.msra.mxu0 %v4920_v26  ;;  %2054 = vmatprep.subr.bf16.mxu1 %v4931_v29  ;;  %v5015_v26 = vld [vmem:[#allocation5 + $0x3cc] ss:$24 sps:$4 sm:$0xff]  }
  0xd7   :  { %2011 = vmatprep.subr.bf16.mxu0 %v4928_v28  ;;  %v5013_v28 = vld [vmem:[#allocation5 + $0x3c8] ss:$24 sps:$4 sm:$0xff]   ;;  %v5024_v29 = vld [vmem:[#allocation5 + $0x104] ss:$24 sps:$4 sm:$0xff]  }
  0xd9   :  { %2055 = vmatpush1.bf16.msra.mxu1 %v4929_v31  ;;  %v5022_v31 = vld [vmem:[#allocation5 + $0x100] ss:$24 sps:$4 sm:$0xff]  }
  0xda   :  { %2012 = vmatpush1.bf16.msra.mxu0 %v4926_v30  ;;  %2056 = vmatprep.subr.bf16.mxu1 %v4937_v33  ;;  %v5019_v30 = vld [vmem:[#allocation5 + $0x3f8] ss:$24 sps:$4 sm:$0xff]   ;;  %v5030_v33 = vld [vmem:[#allocation5 + $0x134] ss:$24 sps:$4 sm:$0xff]  }
  0xdb   :  { %2013 = vmatprep.subr.bf16.mxu0 %v4934_v32  ;;  %v5027_v32 = vld [vmem:[#allocation5 + $0x42c] ss:$24 sps:$4 sm:$0xff]  }
  0xdd   :  { %2057 = vmatpush1.bf16.msra.mxu1 %v4935_v36  ;;  %v5028_v36 = vld [vmem:[#allocation5 + $0x130] ss:$24 sps:$4 sm:$0xff]  }
  0xde   :  { %2014 = vmatpush1.bf16.msra.mxu0 %v4932_v35  ;;  %2058 = vmatprep.subr.bf16.mxu1 %v4943_v38  ;;  %v5025_v35 = vld [vmem:[#allocation5 + $0x428] ss:$24 sps:$4 sm:$0xff]   ;;  %v5036_v38 = vld [vmem:[#allocation5 + $0x164] ss:$24 sps:$4 sm:$0xff]  }
  0xdf   :  { %2015 = vmatprep.subr.bf16.mxu0 %v4940_v37  ;;  %v5033_v37 = vld [vmem:[#allocation5 + $0x45c] ss:$24 sps:$4 sm:$0xff]  }
  0xe1   :  { %2059 = vmatpush1.bf16.msra.mxu1 %v4941_v40  ;;  %v5034_v40 = vld [vmem:[#allocation5 + $0x160] ss:$24 sps:$4 sm:$0xff]  }
  0xe2   :  { %2016 = vmatpush1.bf16.msra.mxu0 %v4938_v39  ;;  %2060 = vmatprep.subr.bf16.mxu1 %v4949_v42  ;;  %v5031_v39 = vld [vmem:[#allocation5 + $0x458] ss:$24 sps:$4 sm:$0xff]   ;;  %v5042_v42 = vld [vmem:[#allocation5 + $0x194] ss:$24 sps:$4 sm:$0xff]  }
  0xe3   :  { %2017 = vmatprep.subr.bf16.mxu0 %v4946_v41  ;;  %v5039_v41 = vld [vmem:[#allocation5 + $0x48c] ss:$24 sps:$4 sm:$0xff]  }
  0xe5   :  { %2061 = vmatpush1.bf16.msra.mxu1 %v4947_v44  ;;  %v5040_v44 = vld [vmem:[#allocation5 + $0x190] ss:$24 sps:$4 sm:$0xff]  }
  0xe6   :  { %2018 = vmatpush1.bf16.msra.mxu0 %v4944_v43  ;;  %2062 = vmatprep.subr.bf16.mxu1 %v4955_v46  ;;  %v5037_v43 = vld [vmem:[#allocation5 + $0x488] ss:$24 sps:$4 sm:$0xff]   ;;  %v5048_v46 = vld [vmem:[#allocation5 + $0x1c4] ss:$24 sps:$4 sm:$0xff]  }
  0xe7   :  { %2019 = vmatprep.subr.bf16.mxu0 %v4952_v45  ;;  %v5045_v45 = vld [vmem:[#allocation5 + $0x4bc] ss:$24 sps:$4 sm:$0xff]  }
  0xe9   :  { %2063 = vmatpush1.bf16.msra.mxu1 %v4953_v48  ;;  %v5046_v48 = vld [vmem:[#allocation5 + $0x1c0] ss:$24 sps:$4 sm:$0xff]  }
  0xea   :  { %2020 = vmatpush1.bf16.msra.mxu0 %v4950_v47  ;;  %2064 = vmatprep.subr.bf16.mxu1 %v4961_v52  ;;  %v5043_v47 = vld [vmem:[#allocation5 + $0x4b8] ss:$24 sps:$4 sm:$0xff]   ;;  %v5054_v52 = vld [vmem:[#allocation5 + $0x1f4] ss:$24 sps:$4 sm:$0xff]  }
  0xeb   :  { %2021 = vmatprep.subr.bf16.mxu0 %v4958_v51  ;;  %v5051_v51 = vld [vmem:[#allocation5 + $0x4ec] ss:$24 sps:$4 sm:$0xff]  }
  0xed   :  { %2065 = vmatpush1.bf16.msra.mxu1 %v4959_v54  ;;  %v5052_v54 = vld [vmem:[#allocation5 + $0x1f0] ss:$24 sps:$4 sm:$0xff]  }
  0xee   :  { %2022 = vmatpush1.bf16.msra.mxu0 %v4956_v53  ;;  %2066 = vmatprep.subr.bf16.mxu1 %v4967_v56  ;;  %v5049_v53 = vld [vmem:[#allocation5 + $0x4e8] ss:$24 sps:$4 sm:$0xff]   ;;  %v5060_v56 = vld [vmem:[#allocation5 + $0x224] ss:$24 sps:$4 sm:$0xff]  }
  0xef   :  { %2023 = vmatprep.subr.bf16.mxu0 %v4964_v55  ;;  %v5057_v55 = vld [vmem:[#allocation5 + $0x51c] ss:$24 sps:$4 sm:$0xff]  }
  0xf1   :  { %2067 = vmatpush1.bf16.msra.mxu1 %v4965_v58  ;;  %v5058_v58 = vld [vmem:[#allocation5 + $0x220] ss:$24 sps:$4 sm:$0xff]  }
  0xf2   :  { %2024 = vmatpush1.bf16.msra.mxu0 %v4962_v57  ;;  %2068 = vmatprep.subr.bf16.mxu1 %v4973_v60  ;;  %v5055_v57 = vld [vmem:[#allocation5 + $0x518] ss:$24 sps:$4 sm:$0xff]   ;;  %v5066_v60 = vld [vmem:[#allocation5 + $0x254] ss:$24 sps:$4 sm:$0xff]  }
  0xf3   :  { %2025 = vmatprep.subr.bf16.mxu0 %v4970_v59  ;;  %v5063_v59 = vld [vmem:[#allocation5 + $0x54c] ss:$24 sps:$4 sm:$0xff]  }
  0xf5   :  { %2069 = vmatpush1.bf16.msra.mxu1 %v4971_v62  ;;  %v5064_v62 = vld [vmem:[#allocation5 + $0x250] ss:$24 sps:$4 sm:$0xff]  }
  0xf6   :  { %2026 = vmatpush1.bf16.msra.mxu0 %v4968_v61  ;;  %2070 = vmatprep.subr.bf16.mxu1 %v4979_v0  ;;  %v5061_v61 = vld [vmem:[#allocation5 + $0x548] ss:$24 sps:$4 sm:$0xff]   ;;  %v5072_v0 = vld [vmem:[#allocation5 + $0x284] ss:$24 sps:$4 sm:$0xff]  }
  0xf7   :  { %2027 = vmatprep.subr.bf16.mxu0 %v4976_v63  ;;  %v5069_v63 = vld [vmem:[#allocation5 + $0x57c] ss:$24 sps:$4 sm:$0xff]  }
  0xf9   :  { %2071 = vmatpush1.bf16.msra.mxu1 %v4977_v2  ;;  %v5070_v2 = vld [vmem:[#allocation5 + $0x280] ss:$24 sps:$4 sm:$0xff]  }
  0xfa   :  { %2028 = vmatpush1.bf16.msra.mxu0 %v4974_v1  ;;  %2072 = vmatprep.subr.bf16.mxu1 %v4985_v5  ;;  %v5067_v1 = vld [vmem:[#allocation5 + $0x578] ss:$24 sps:$4 sm:$0xff]   ;;  %v5078_v5 = vld [vmem:[#allocation5 + $0x2b4] ss:$24 sps:$4 sm:$0xff]  }
  0xfb   :  { %2029 = vmatprep.subr.bf16.mxu0 %v4982_v3  ;;  %v5075_v3 = vld [vmem:[#allocation5 + $0x5ac] ss:$24 sps:$4 sm:$0xff]  }
  0xfd   :  { %2073 = vmatpush1.bf16.msra.mxu1 %v4983_v8  ;;  %v5076_v8 = vld [vmem:[#allocation5 + $0x2b0] ss:$24 sps:$4 sm:$0xff]  }
  0xfe   :  { %2030 = vmatpush1.bf16.msra.mxu0 %v4980_v6  ;;  %2085 = vmatprep.subr.bf16.mxu1 %v4991_v9  ;;  %v5073_v6 = vld [vmem:[#allocation5 + $0x5a8] ss:$24 sps:$4 sm:$0xff]   ;;  %v5081_v9 = vld [vmem:[#allocation5 + $0x5dc] ss:$24 sps:$4 sm:$0xff]  }
  0xff   :  { %2171 = vmatprep.subr.bf16.mxu0 %v4994_v10  ;;  %v5084_v10 = vld [vmem:[#allocation5 + $0x2e4] ss:$24 sps:$4 sm:$0xff]  }
 0x100   :  { %2075 = vmatmul.mubr.bf16.vlgmr.msra.gmra.mrb[4].mxu1 %v5930_v4 }
 0x101   :  { %2032 = vmatmul.mubr.bf16.vlgmr.msra.gmra.mrb[0].mxu0 %v5940_v11  ;;  %2086 = vmatpush1.bf16.msra.mxu1 %v4989_v12  ;;  %v5079_v12 = vld [vmem:[#allocation5 + $0x5d8] ss:$24 sps:$4 sm:$0xff]  }
 0x102   :  { %2172 = vmatpush1.bf16.msra.mxu0 %v4992_v13  ;;  %2087 = vmatprep.subr.bf16.mxu1 %v4997_v14  ;;  %v5082_v13 = vld [vmem:[#allocation5 + $0x2e0] ss:$24 sps:$4 sm:$0xff]   ;;  %v5087_v14 = vld [vmem:[#allocation5 + $0x60c] ss:$24 sps:$4 sm:$0xff]  }
 0x103   :  { %2173 = vmatprep.subr.bf16.mxu0 %v5000_v15  ;;  %2117 = vmatprep.mubr.bf16.mxu1 %v5926_v50  ;;  %v5016_v50 = vld [vmem:[#allocation5 + $0xd0] ss:$24 sps:$4 sm:$0xff]   ;;  %v5090_v15 = vld [vmem:[#allocation5 + $0x314] ss:$24 sps:$4 sm:$0xff]  }
 0x104   :  { %2203 = vmatprep.mubr.bf16.mxu0 %v5924_v49  ;;  %v5021_v49 = vld [vmem:[#allocation5 + $0x3fc] ss:$24 sps:$4 sm:$0xff]  }
 0x105   :  { %2088 = vmatpush1.bf16.msra.mxu1 %v4995_v16  ;;  %v5085_v16 = vld [vmem:[#allocation5 + $0x608] ss:$24 sps:$4 sm:$0xff]  }
 0x106   :  { %2174 = vmatpush1.bf16.msra.mxu0 %v4998_v17  ;;  %2089 = vmatprep.subr.bf16.mxu1 %v5003_v18  ;;  %v5088_v17 = vld [vmem:[#allocation5 + $0x310] ss:$24 sps:$4 sm:$0xff]   ;;  %v5093_v18 = vld [vmem:[#allocation5 + $0x63c] ss:$24 sps:$4 sm:$0xff]  }
 0x107   :  { %2175 = vmatprep.subr.bf16.mxu0 %v5006_v19  ;;  %v5096_v19 = vld [vmem:[#allocation5 + $0x344] ss:$24 sps:$4 sm:$0xff]  }
 0x109   :  { %2090 = vmatpush1.bf16.msra.mxu1 %v5001_v20  ;;  %v5091_v20 = vld [vmem:[#allocation5 + $0x638] ss:$24 sps:$4 sm:$0xff]  }
 0x10a   :  { %2176 = vmatpush1.bf16.msra.mxu0 %v5004_v21  ;;  %2091 = vmatprep.subr.bf16.mxu1 %v5009_v22  ;;  %v5094_v21 = vld [vmem:[#allocation5 + $0x340] ss:$24 sps:$4 sm:$0xff]   ;;  %v5099_v22 = vld [vmem:[#allocation5 + $0x66c] ss:$24 sps:$4 sm:$0xff]  }
 0x10b   :  { %2177 = vmatprep.subr.bf16.mxu0 %v5012_v23  ;;  %v5102_v23 = vld [vmem:[#allocation5 + $0x374] ss:$24 sps:$4 sm:$0xff]  }
 0x10d   :  { %2092 = vmatpush1.bf16.msra.mxu1 %v5007_v24  ;;  %v5581_v24 = vld [vmem:[#allocation2 + $0xc] ss:$24 sps:$4 sm:$0xff]  }
 0x10e   :  { %2178 = vmatpush1.bf16.msra.mxu0 %v5010_v25  ;;  %2093 = vmatprep.subr.bf16.mxu1 %v5015_v26  ;;  %v5097_v25 = vld [vmem:[#allocation5 + $0x668] ss:$24 sps:$4 sm:$0xff]  }
 0x10f   :  { %2179 = vmatprep.subr.bf16.mxu0 %v5018_v27  ;;  %v5100_v26 = vld [vmem:[#allocation5 + $0x370] ss:$24 sps:$4 sm:$0xff]  }
 0x110   :  { %v5103_v27 = vld [vmem:[#allocation5 + $0x698] ss:$24 sps:$4 sm:$0xff]  }
 0x111   :  { %2094 = vmatpush1.bf16.msra.mxu1 %v5013_v28  ;;  %v5106_v28 = vld [vmem:[#allocation5 + $0x3a0] ss:$24 sps:$4 sm:$0xff]  }
 0x112   :  { %2180 = vmatpush1.bf16.msra.mxu0 %v5016_v50  ;;  %2095 = vmatprep.subr.bf16.mxu1 %v5021_v49  ;;  %v5111_v50 = vld [vmem:[#allocation5 + $0x6cc] ss:$24 sps:$4 sm:$0xff]  }
 0x113   :  { %2181 = vmatprep.subr.bf16.mxu0 %v5024_v29  ;;  %v5114_v49 = vld [vmem:[#allocation5 + $0x3d4] ss:$24 sps:$4 sm:$0xff]   ;;  %v5109_v29 = vld [vmem:[#allocation5 + $0x6c8] ss:$24 sps:$4 sm:$0xff]  }
 0x115   :  { %2096 = vmatpush1.bf16.msra.mxu1 %v5019_v30  ;;  %v5117_v30 = vld [vmem:[#allocation5 + $0x6fc] ss:$24 sps:$4 sm:$0xff]  }
 0x116   :  { %2182 = vmatpush1.bf16.msra.mxu0 %v5022_v31  ;;  %2097 = vmatprep.subr.bf16.mxu1 %v5027_v32  ;;  %v5120_v31 = vld [vmem:[#allocation5 + $0x404] ss:$24 sps:$4 sm:$0xff]   ;;  %v5115_v32 = vld [vmem:[#allocation5 + $0x6f8] ss:$24 sps:$4 sm:$0xff]  }
 0x117   :  { %2183 = vmatprep.subr.bf16.mxu0 %v5030_v33  ;;  %v5118_v33 = vld [vmem:[#allocation5 + $0x400] ss:$24 sps:$4 sm:$0xff]  }
 0x119   :  { %2098 = vmatpush1.bf16.msra.mxu1 %v5025_v35  ;;  %v5123_v35 = vld [vmem:[#allocation5 + $0x72c] ss:$24 sps:$4 sm:$0xff]  }
 0x11a   :  { %2184 = vmatpush1.bf16.msra.mxu0 %v5028_v36  ;;  %2099 = vmatprep.subr.bf16.mxu1 %v5033_v37  ;;  %v5126_v36 = vld [vmem:[#allocation5 + $0x434] ss:$24 sps:$4 sm:$0xff]   ;;  %v5121_v37 = vld [vmem:[#allocation5 + $0x728] ss:$24 sps:$4 sm:$0xff]  }
 0x11b   :  { %2185 = vmatprep.subr.bf16.mxu0 %v5036_v38  ;;  %v5124_v38 = vld [vmem:[#allocation5 + $0x430] ss:$24 sps:$4 sm:$0xff]  }
 0x11d   :  { %2100 = vmatpush1.bf16.msra.mxu1 %v5031_v39  ;;  %v5129_v39 = vld [vmem:[#allocation5 + $0x75c] ss:$24 sps:$4 sm:$0xff]  }
 0x11e   :  { %2186 = vmatpush1.bf16.msra.mxu0 %v5034_v40  ;;  %2101 = vmatprep.subr.bf16.mxu1 %v5039_v41  ;;  %v5132_v40 = vld [vmem:[#allocation5 + $0x464] ss:$24 sps:$4 sm:$0xff]   ;;  %v5127_v41 = vld [vmem:[#allocation5 + $0x758] ss:$24 sps:$4 sm:$0xff]  }
 0x11f   :  { %2187 = vmatprep.subr.bf16.mxu0 %v5042_v42  ;;  %v5130_v42 = vld [vmem:[#allocation5 + $0x460] ss:$24 sps:$4 sm:$0xff]  }
 0x121   :  { %2102 = vmatpush1.bf16.msra.mxu1 %v5037_v43  ;;  %v5135_v43 = vld [vmem:[#allocation5 + $0x78c] ss:$24 sps:$4 sm:$0xff]  }
 0x122   :  { %2188 = vmatpush1.bf16.msra.mxu0 %v5040_v44  ;;  %2103 = vmatprep.subr.bf16.mxu1 %v5045_v45  ;;  %v5138_v44 = vld [vmem:[#allocation5 + $0x494] ss:$24 sps:$4 sm:$0xff]   ;;  %v5133_v45 = vld [vmem:[#allocation5 + $0x788] ss:$24 sps:$4 sm:$0xff]  }
 0x123   :  { %2189 = vmatprep.subr.bf16.mxu0 %v5048_v46  ;;  %v5136_v46 = vld [vmem:[#allocation5 + $0x490] ss:$24 sps:$4 sm:$0xff]  }
 0x125   :  { %2104 = vmatpush1.bf16.msra.mxu1 %v5043_v47  ;;  %v5141_v47 = vld [vmem:[#allocation5 + $0x7bc] ss:$24 sps:$4 sm:$0xff]  }
 0x126   :  { %2190 = vmatpush1.bf16.msra.mxu0 %v5046_v48  ;;  %2105 = vmatprep.subr.bf16.mxu1 %v5051_v51  ;;  %v5144_v48 = vld [vmem:[#allocation5 + $0x4c4] ss:$24 sps:$4 sm:$0xff]   ;;  %v5139_v51 = vld [vmem:[#allocation5 + $0x7b8] ss:$24 sps:$4 sm:$0xff]  }
 0x127   :  { %2191 = vmatprep.subr.bf16.mxu0 %v5054_v52  ;;  %v5142_v52 = vld [vmem:[#allocation5 + $0x4c0] ss:$24 sps:$4 sm:$0xff]  }
 0x129   :  { %2106 = vmatpush1.bf16.msra.mxu1 %v5049_v53  ;;  %v5147_v53 = vld [vmem:[#allocation5 + $0x7ec] ss:$24 sps:$4 sm:$0xff]  }
 0x12a   :  { %2192 = vmatpush1.bf16.msra.mxu0 %v5052_v54  ;;  %2107 = vmatprep.subr.bf16.mxu1 %v5057_v55  ;;  %v5150_v54 = vld [vmem:[#allocation5 + $0x4f4] ss:$24 sps:$4 sm:$0xff]   ;;  %v5145_v55 = vld [vmem:[#allocation5 + $0x7e8] ss:$24 sps:$4 sm:$0xff]  }
 0x12b   :  { %2193 = vmatprep.subr.bf16.mxu0 %v5060_v56  ;;  %v5148_v56 = vld [vmem:[#allocation5 + $0x4f0] ss:$24 sps:$4 sm:$0xff]  }
 0x12d   :  { %2108 = vmatpush1.bf16.msra.mxu1 %v5055_v57  ;;  %v5153_v57 = vld [vmem:[#allocation5 + $0x81c] ss:$24 sps:$4 sm:$0xff]  }
 0x12e   :  { %2194 = vmatpush1.bf16.msra.mxu0 %v5058_v58  ;;  %2109 = vmatprep.subr.bf16.mxu1 %v5063_v59  ;;  %v5156_v58 = vld [vmem:[#allocation5 + $0x524] ss:$24 sps:$4 sm:$0xff]   ;;  %v5151_v59 = vld [vmem:[#allocation5 + $0x818] ss:$24 sps:$4 sm:$0xff]  }
 0x12f   :  { %2195 = vmatprep.subr.bf16.mxu0 %v5066_v60  ;;  %v5154_v60 = vld [vmem:[#allocation5 + $0x520] ss:$24 sps:$4 sm:$0xff]  }
 0x131   :  { %2110 = vmatpush1.bf16.msra.mxu1 %v5061_v61  ;;  %v5159_v61 = vld [vmem:[#allocation5 + $0x84c] ss:$24 sps:$4 sm:$0xff]  }
 0x132   :  { %2196 = vmatpush1.bf16.msra.mxu0 %v5064_v62  ;;  %2111 = vmatprep.subr.bf16.mxu1 %v5069_v63  ;;  %v5162_v62 = vld [vmem:[#allocation5 + $0x554] ss:$24 sps:$4 sm:$0xff]   ;;  %v5157_v63 = vld [vmem:[#allocation5 + $0x848] ss:$24 sps:$4 sm:$0xff]  }
 0x133   :  { %2197 = vmatprep.subr.bf16.mxu0 %v5072_v0  ;;  %v5160_v0 = vld [vmem:[#allocation5 + $0x550] ss:$24 sps:$4 sm:$0xff]  }
 0x135   :  { %2112 = vmatpush1.bf16.msra.mxu1 %v5067_v1  ;;  %v5165_v1 = vld [vmem:[#allocation5 + $0x87c] ss:$24 sps:$4 sm:$0xff]  }
 0x136   :  { %2198 = vmatpush1.bf16.msra.mxu0 %v5070_v2  ;;  %2113 = vmatprep.subr.bf16.mxu1 %v5075_v3  ;;  %v5168_v2 = vld [vmem:[#allocation5 + $0x584] ss:$24 sps:$4 sm:$0xff]   ;;  %v5163_v3 = vld [vmem:[#allocation5 + $0x878] ss:$24 sps:$4 sm:$0xff]  }
 0x137   :  { %2199 = vmatprep.subr.bf16.mxu0 %v5078_v5  ;;  %v5166_v5 = vld [vmem:[#allocation5 + $0x580] ss:$24 sps:$4 sm:$0xff]  }
 0x139   :  { %2114 = vmatpush1.bf16.msra.mxu1 %v5073_v6  ;;  %v5171_v6 = vld [vmem:[#allocation5 + $0x8ac] ss:$24 sps:$4 sm:$0xff]  }
 0x13a   :  { %2200 = vmatpush1.bf16.msra.mxu0 %v5076_v8  ;;  %2115 = vmatprep.subr.bf16.mxu1 %v5081_v9  ;;  %v5174_v8 = vld [vmem:[#allocation5 + $0x5b4] ss:$24 sps:$4 sm:$0xff]   ;;  %v5169_v9 = vld [vmem:[#allocation5 + $0x8a8] ss:$24 sps:$4 sm:$0xff]  }
 0x13b   :  { %2201 = vmatprep.subr.bf16.mxu0 %v5084_v10  ;;  %v5172_v10 = vld [vmem:[#allocation5 + $0x5b0] ss:$24 sps:$4 sm:$0xff]  }
 0x13d   :  { %2116 = vmatpush1.bf16.msra.mxu1 %v5079_v12  ;;  %v5177_v12 = vld [vmem:[#allocation5 + $0x8dc] ss:$24 sps:$4 sm:$0xff]  }
 0x13e   :  { %2202 = vmatpush1.bf16.msra.mxu0 %v5082_v13  ;;  %2128 = vmatprep.subr.bf16.mxu1 %v5087_v14  ;;  %v5180_v13 = vld [vmem:[#allocation5 + $0x5e4] ss:$24 sps:$4 sm:$0xff]   ;;  %v5175_v14 = vld [vmem:[#allocation5 + $0x8d8] ss:$24 sps:$4 sm:$0xff]  }
 0x13f   :  { %2214 = vmatprep.subr.bf16.mxu0 %v5090_v15  ;;  %v5178_v15 = vld [vmem:[#allocation5 + $0x5e0] ss:$24 sps:$4 sm:$0xff]  }
 0x140   :  { %2118 = vmatmul.mubr.bf16.vlgmr.msra.gmra.mrb[4].mxu1 %v5932_v7  ;;  %v5105_v7 = vld [vmem:[#allocation5 + $0x69c] ss:$24 sps:$4 sm:$0xff]  }
 0x141   :  { %2204 = vmatmul.mubr.bf16.vlgmr.msra.gmra.mrb[4].mxu0 %v5930_v4  ;;  %2129 = vmatpush1.bf16.msra.mxu1 %v5085_v16  ;;  %v5108_v4 = vld [vmem:[#allocation5 + $0x3a4] ss:$24 sps:$4 sm:$0xff]   ;;  %v5183_v16 = vld [vmem:[#allocation5 + $0x614] ss:$24 sps:$4 sm:$0xff]  }
 0x142   :  { %2215 = vmatpush1.bf16.msra.mxu0 %v5088_v17  ;;  %2130 = vmatprep.subr.bf16.mxu1 %v5093_v18  ;;  %v5213_v17 = vld [vmem:[#allocation8 + $0x4] ss:$16 sps:$4 sm:$0xff]  }
 0x143   :  { %2216 = vmatprep.subr.bf16.mxu0 %v5096_v19  ;;  %2160 = vmatprep.mubr.bf16.mxu1 %v5937_v34  ;;  %v5112_v34 = vld [vmem:[#allocation5 + $0x3d0] ss:$24 sps:$4 sm:$0xff]  }
 0x144   :  { %2246 = vmatprep.mubr.bf16.mxu0 %v5581_v24  ;;  %v5181_v18 = vld [vmem:[#allocation5 + $0x610] ss:$24 sps:$4 sm:$0xff]  }
 0x145   :  { %2131 = vmatpush1.bf16.msra.mxu1 %v5091_v20  ;;  %v5211_v19 = vld [vmem:[#allocation8] ss:$16 sps:$4 sm:$0xff]  }
 0x146   :  { %2217 = vmatpush1.bf16.msra.mxu0 %v5094_v21  ;;  %2132 = vmatprep.subr.bf16.mxu1 %v5099_v22  ;;  %v5186_v20 = vld [vmem:[#allocation5 + $0x644] ss:$24 sps:$4 sm:$0xff]   ;;  %v5582_v22 = vld [vmem:[#allocation2 + $0x8] ss:$24 sps:$4 sm:$0xff]  }
 0x147   :  { %2218 = vmatprep.subr.bf16.mxu0 %v5102_v23  ;;  %v5219_v21 = vld [vmem:[#allocation8 + $0x24] ss:$16 sps:$4 sm:$0xff]   ;;  %v5217_v24 = vld [vmem:[#allocation8 + $0x20] ss:$16 sps:$4 sm:$0xff]  }
 0x148   :  { %v5184_v23 = vld [vmem:[#allocation5 + $0x640] ss:$24 sps:$4 sm:$0xff]  }
 0x149   :  { %2133 = vmatpush1.bf16.msra.mxu1 %v5097_v25  ;;  %v5189_v25 = vld [vmem:[#allocation5 + $0x674] ss:$24 sps:$4 sm:$0xff]  }
 0x14a   :  { %2219 = vmatpush1.bf16.msra.mxu0 %v5100_v26  ;;  %2134 = vmatprep.subr.bf16.mxu1 %v5105_v7  ;;  %v5225_v26 = vld [vmem:[#allocation8 + $0x44] ss:$16 sps:$4 sm:$0xff]  }
 0x14b   :  { %2220 = vmatprep.subr.bf16.mxu0 %v5108_v4  ;;  %v5583_v7 = vld [vmem:[#allocation2 + $0x14] ss:$24 sps:$4 sm:$0xff]   ;;  %v5187_v4 = vld [vmem:[#allocation5 + $0x670] ss:$24 sps:$4 sm:$0xff]  }
 0x14d   :  { %2135 = vmatpush1.bf16.msra.mxu1 %v5103_v27  ;;  %v5192_v27 = vld [vmem:[#allocation5 + $0x6a4] ss:$24 sps:$4 sm:$0xff]  }
 0x14e   :  { %2221 = vmatpush1.bf16.msra.mxu0 %v5106_v28  ;;  %2136 = vmatprep.subr.bf16.mxu1 %v5111_v50  ;;  %v5223_v28 = vld [vmem:[#allocation8 + $0x40] ss:$16 sps:$4 sm:$0xff]  }
 0x14f   :  { %2222 = vmatprep.subr.bf16.mxu0 %v5114_v49  ;;  %v5190_v50 = vld [vmem:[#allocation5 + $0x6a0] ss:$24 sps:$4 sm:$0xff]   ;;  %v5195_v49 = vld [vmem:[#allocation5 + $0x6d4] ss:$24 sps:$4 sm:$0xff]  }
 0x151   :  { %2137 = vmatpush1.bf16.msra.mxu1 %v5109_v29  ;;  %v5229_v29 = vld [vmem:[#allocation8 + $0x60] ss:$16 sps:$4 sm:$0xff]  }
 0x152   :  { %2223 = vmatpush1.bf16.msra.mxu0 %v5112_v34  ;;  %2138 = vmatprep.subr.bf16.mxu1 %v5117_v30  ;;  %v5237_v34 = vld [vmem:[#allocation8 + $0x84] ss:$16 sps:$4 sm:$0xff]  }
 0x153   :  { %2224 = vmatprep.subr.bf16.mxu0 %v5120_v31  ;;  %v5193_v30 = vld [vmem:[#allocation5 + $0x6d0] ss:$24 sps:$4 sm:$0xff]   ;;  %v5198_v31 = vld [vmem:[#allocation5 + $0x704] ss:$24 sps:$4 sm:$0xff]  }
 0x155   :  { %2139 = vmatpush1.bf16.msra.mxu1 %v5115_v32  ;;  %v5235_v32 = vld [vmem:[#allocation8 + $0x80] ss:$16 sps:$4 sm:$0xff]  }
 0x156   :  { %2225 = vmatpush1.bf16.msra.mxu0 %v5118_v33  ;;  %2140 = vmatprep.subr.bf16.mxu1 %v5123_v35  ;;  %v5243_v33 = vld [vmem:[#allocation8 + $0xa4] ss:$16 sps:$4 sm:$0xff]  }
 0x157   :  { %2226 = vmatprep.subr.bf16.mxu0 %v5126_v36  ;;  %v5196_v35 = vld [vmem:[#allocation5 + $0x700] ss:$24 sps:$4 sm:$0xff]   ;;  %v5201_v36 = vld [vmem:[#allocation5 + $0x734] ss:$24 sps:$4 sm:$0xff]  }
 0x159   :  { %2141 = vmatpush1.bf16.msra.mxu1 %v5121_v37  ;;  %v5241_v37 = vld [vmem:[#allocation8 + $0xa0] ss:$16 sps:$4 sm:$0xff]  }
 0x15a   :  { %2227 = vmatpush1.bf16.msra.mxu0 %v5124_v38  ;;  %2142 = vmatprep.subr.bf16.mxu1 %v5129_v39  ;;  %v5249_v38 = vld [vmem:[#allocation8 + $0xc4] ss:$16 sps:$4 sm:$0xff]  }
 0x15b   :  { %2228 = vmatprep.subr.bf16.mxu0 %v5132_v40 }
 0x15d   :  { %2143 = vmatpush1.bf16.msra.mxu1 %v5127_v41 }
 0x15e   :  { %2229 = vmatpush1.bf16.msra.mxu0 %v5130_v42  ;;  %2144 = vmatprep.subr.bf16.mxu1 %v5135_v43  ;;  %v5199_v42 = vld [vmem:[#allocation5 + $0x730] ss:$24 sps:$4 sm:$0xff]  }
 0x15f   :  { %2230 = vmatprep.subr.bf16.mxu0 %v5138_v44  ;;  %v5247_v43 = vld [vmem:[#allocation8 + $0xc0] ss:$16 sps:$4 sm:$0xff]  }
 0x161   :  { %2145 = vmatpush1.bf16.msra.mxu1 %v5133_v45  ;;  %v5204_v45 = vld [vmem:[#allocation5 + $0x764] ss:$24 sps:$4 sm:$0xff]  }
 0x162   :  { %2231 = vmatpush1.bf16.msra.mxu0 %v5136_v46  ;;  %2146 = vmatprep.subr.bf16.mxu1 %v5141_v47  ;;  %v5255_v46 = vld [vmem:[#allocation8 + $0xe4] ss:$16 sps:$4 sm:$0xff]  }
 0x163   :  { %2232 = vmatprep.subr.bf16.mxu0 %v5144_v48  ;;  %v5202_v47 = vld [vmem:[#allocation5 + $0x760] ss:$24 sps:$4 sm:$0xff]   ;;  %v5207_v48 = vld [vmem:[#allocation5 + $0x794] ss:$24 sps:$4 sm:$0xff]  }
 0x165   :  { %2147 = vmatpush1.bf16.msra.mxu1 %v5139_v51  ;;  %v5253_v51 = vld [vmem:[#allocation8 + $0xe0] ss:$16 sps:$4 sm:$0xff]  }
 0x166   :  { %2233 = vmatpush1.bf16.msra.mxu0 %v5142_v52  ;;  %2148 = vmatprep.subr.bf16.mxu1 %v5147_v53  ;;  %v5261_v52 = vld [vmem:[#allocation8 + $0x104] ss:$16 sps:$4 sm:$0xff]  }
 0x167   :  { %2234 = vmatprep.subr.bf16.mxu0 %v5150_v54  ;;  %v5205_v53 = vld [vmem:[#allocation5 + $0x790] ss:$24 sps:$4 sm:$0xff]   ;;  %v5210_v54 = vld [vmem:[#allocation5 + $0x7c4] ss:$24 sps:$4 sm:$0xff]  }
 0x169   :  { %2149 = vmatpush1.bf16.msra.mxu1 %v5145_v55  ;;  %v5259_v55 = vld [vmem:[#allocation8 + $0x100] ss:$16 sps:$4 sm:$0xff]  }
 0x16a   :  { %2235 = vmatpush1.bf16.msra.mxu0 %v5148_v56  ;;  %2150 = vmatprep.subr.bf16.mxu1 %v5153_v57  ;;  %v5267_v56 = vld [vmem:[#allocation8 + $0x124] ss:$16 sps:$4 sm:$0xff]  }
 0x16b   :  { %2236 = vmatprep.subr.bf16.mxu0 %v5156_v58  ;;  %v5208_v57 = vld [vmem:[#allocation5 + $0x7c0] ss:$24 sps:$4 sm:$0xff]   ;;  %v5216_v58 = vld [vmem:[#allocation5 + $0x7f4] ss:$24 sps:$4 sm:$0xff]  }
 0x16d   :  { %2151 = vmatpush1.bf16.msra.mxu1 %v5151_v59  ;;  %v5265_v59 = vld [vmem:[#allocation8 + $0x120] ss:$16 sps:$4 sm:$0xff]  }
 0x16e   :  { %2237 = vmatpush1.bf16.msra.mxu0 %v5154_v60  ;;  %2152 = vmatprep.subr.bf16.mxu1 %v5159_v61  ;;  %v5273_v60 = vld [vmem:[#allocation8 + $0x144] ss:$16 sps:$4 sm:$0xff]  }
 0x16f   :  { %2238 = vmatprep.subr.bf16.mxu0 %v5162_v62  ;;  %v5214_v61 = vld [vmem:[#allocation5 + $0x7f0] ss:$24 sps:$4 sm:$0xff]   ;;  %v5222_v62 = vld [vmem:[#allocation5 + $0x824] ss:$24 sps:$4 sm:$0xff]  }
 0x171   :  { %2153 = vmatpush1.bf16.msra.mxu1 %v5157_v63  ;;  %v5271_v63 = vld [vmem:[#allocation8 + $0x140] ss:$16 sps:$4 sm:$0xff]  }
 0x172   :  { %2239 = vmatpush1.bf16.msra.mxu0 %v5160_v0  ;;  %2154 = vmatprep.subr.bf16.mxu1 %v5165_v1  ;;  %v5279_v0 = vld [vmem:[#allocation8 + $0x164] ss:$16 sps:$4 sm:$0xff]  }
 0x173   :  { %2240 = vmatprep.subr.bf16.mxu0 %v5168_v2  ;;  %v5220_v1 = vld [vmem:[#allocation5 + $0x820] ss:$24 sps:$4 sm:$0xff]  }
 0x174   :  { %v5277_v2 = vld [vmem:[#allocation8 + $0x160] ss:$16 sps:$4 sm:$0xff]  }
 0x175   :  { %2155 = vmatpush1.bf16.msra.mxu1 %v5163_v3  ;;  %v5228_v3 = vld [vmem:[#allocation5 + $0x854] ss:$24 sps:$4 sm:$0xff]  }
 0x176   :  { %2241 = vmatpush1.bf16.msra.mxu0 %v5166_v5  ;;  %2156 = vmatprep.subr.bf16.mxu1 %v5171_v6  ;;  %v5285_v5 = vld [vmem:[#allocation8 + $0x184] ss:$16 sps:$4 sm:$0xff]  }
 0x177   :  { %2242 = vmatprep.subr.bf16.mxu0 %v5174_v8  ;;  %v5226_v6 = vld [vmem:[#allocation5 + $0x850] ss:$24 sps:$4 sm:$0xff]  }
 0x178   :  { %v5283_v8 = vld [vmem:[#allocation8 + $0x180] ss:$16 sps:$4 sm:$0xff]  }
 0x179   :  { %2157 = vmatpush1.bf16.msra.mxu1 %v5169_v9  ;;  %v5234_v9 = vld [vmem:[#allocation5 + $0x884] ss:$24 sps:$4 sm:$0xff]  }
 0x17a   :  { %2243 = vmatpush1.bf16.msra.mxu0 %v5172_v10  ;;  %2158 = vmatprep.subr.bf16.mxu1 %v5177_v12  ;;  %v5291_v10 = vld [vmem:[#allocation8 + $0x1a4] ss:$16 sps:$4 sm:$0xff]  }
 0x17b   :  { %2244 = vmatprep.subr.bf16.mxu0 %v5180_v13  ;;  %v5232_v12 = vld [vmem:[#allocation5 + $0x880] ss:$24 sps:$4 sm:$0xff]  }
 0x17c   :  { %v5289_v13 = vld [vmem:[#allocation8 + $0x1a0] ss:$16 sps:$4 sm:$0xff]  }
 0x17d   :  { %2159 = vmatpush1.bf16.msra.mxu1 %v5175_v14  ;;  %v5240_v14 = vld [vmem:[#allocation5 + $0x8b4] ss:$24 sps:$4 sm:$0xff]  }
 0x17e   :  { %2245 = vmatpush1.bf16.msra.mxu0 %v5178_v15  ;;  %3492 = vmatprep.subr.bf16.mxu1 %v5213_v17  ;;  %v5297_v15 = vld [vmem:[#allocation8 + $0x1c4] ss:$16 sps:$4 sm:$0xff]   ;;  %v5295_v17 = vld [vmem:[#allocation8 + $0x1c0] ss:$16 sps:$4 sm:$0xff]  }
 0x17f   :  { %2257 = vmatprep.subr.bf16.mxu0 %v5183_v16  ;;  %v5238_v16 = vld [vmem:[#allocation5 + $0x8b0] ss:$24 sps:$4 sm:$0xff]  }
 0x180   :  { %2161 = vmatmul.mubr.bf16.vlgmr.msra.gmra.mrb[4].mxu1 %v5940_v11  ;;  %v5231_v11 = vld [vmem:[#allocation8 + $0x64] ss:$16 sps:$4 sm:$0xff]  }
 0x181   :  { %2247 = vmatmul.mubr.bf16.vlgmr.msra.gmra.mrb[4].mxu0 %v5582_v22  ;;  %3493 = vmatpush1.bf16.msra.mxu1 %v5211_v19  ;;  %v5303_v19 = vld [vmem:[#allocation8 + $0x1e4] ss:$16 sps:$4 sm:$0xff]   ;;  %v5252_v22 = vld [vmem:[#allocation8 + $0xc] ss:$16 sps:$4 sm:$0xff]  }
 0x182   :  { %2258 = vmatpush1.bf16.msra.mxu0 %v5181_v18  ;;  %3494 = vmatprep.subr.bf16.mxu1 %v5219_v21  ;;  %v5246_v18 = vld [vmem:[#allocation5 + $0x8e4] ss:$24 sps:$4 sm:$0xff]  }
 0x183   :  { %2259 = vmatprep.subr.bf16.mxu0 %v5186_v20  ;;  %2289 = vmatprep.mubr.bf16.mxu0 %v5583_v7  ;;  %v5244_v20 = vld [vmem:[#allocation5 + $0x8e0] ss:$24 sps:$4 sm:$0xff]  }
 0x184   :  { %v5301_v21 = vld [vmem:[#allocation8 + $0x1e0] ss:$16 sps:$4 sm:$0xff]   ;;  %v5256_v7 = vld [vmem:[#allocation8 + $0x28] ss:$16 sps:$4 sm:$0xff]  }
 0x185   :  { %3495 = vmatpush1.bf16.msra.mxu1 %v5217_v24  ;;  %v5250_v24 = vld [vmem:[#allocation8 + $0x8] ss:$16 sps:$4 sm:$0xff]  }
 0x186   :  { %2260 = vmatpush1.bf16.msra.mxu0 %v5184_v23  ;;  %3496 = vmatprep.subr.bf16.mxu1 %v5225_v26  ;;  %v5327_v23 = vld [vmem:[#allocation8 + $0x204] ss:$16 sps:$4 sm:$0xff]  }
 0x187   :  { %2261 = vmatprep.subr.bf16.mxu0 %v5189_v25  ;;  %v5258_v25 = vld [vmem:[#allocation8 + $0x2c] ss:$16 sps:$4 sm:$0xff]  }
 0x188   :  { %v5584_v26 = vld [vmem:[#allocation2 + $0x10] ss:$24 sps:$4 sm:$0xff]  }
 0x189   :  { %3497 = vmatpush1.bf16.msra.mxu1 %v5223_v28  ;;  %v5262_v28 = vld [vmem:[#allocation8 + $0x48] ss:$16 sps:$4 sm:$0xff]  }
 0x18a   :  { %2262 = vmatpush1.bf16.msra.mxu0 %v5187_v4  ;;  %3498 = vmatprep.subr.bf16.mxu1 %v5231_v11  ;;  %v413_v4 = vlaneseq }
 0x18b   :  { %2263 = vmatprep.subr.bf16.mxu0 %v5192_v27  ;;  %v5264_v27 = vld [vmem:[#allocation8 + $0x4c] ss:$16 sps:$4 sm:$0xff]  }
 0x18c   :  { %v5958_v11 = vshrl.u32 %v413_v4, 7  ;;  %v5363_v4 = vld [vmem:[#allocation8 + $0x2c4] ss:$16 sps:$4 sm:$0xff]  }
 0x18d   :  { %3499 = vmatpush1.bf16.msra.mxu1 %v5229_v29 }
 0x18e   :  { %2264 = vmatpush1.bf16.msra.mxu0 %v5190_v50  ;;  %3500 = vmatprep.subr.bf16.mxu1 %v5237_v34  ;;  %v5270_v50 = vld [vmem:[#allocation8 + $0x6c] ss:$16 sps:$4 sm:$0xff]   ;;  %v415_v29 = vsub.s32 0, %v5958_v11 }
 0x18f   :  { %2265 = vmatprep.subr.bf16.mxu0 %v5195_v49  ;;  %v5268_v49 = vld [vmem:[#allocation8 + $0x68] ss:$16 sps:$4 sm:$0xff]   ;;  %v5276_v34 = vld [vmem:[#allocation8 + $0x8c] ss:$16 sps:$4 sm:$0xff]  }
 0x191   :  { %3501 = vmatpush1.bf16.msra.mxu1 %v5235_v32  ;;  %v5274_v32 = vld [vmem:[#allocation8 + $0x88] ss:$16 sps:$4 sm:$0xff]  }
 0x192   :  { %2266 = vmatpush1.bf16.msra.mxu0 %v5193_v30  ;;  %3502 = vmatprep.subr.bf16.mxu1 %v5243_v33  ;;  %v5961_v30 = vld [vmem:[#allocation7] sm:$0x3f] }
 0x193   :  { %2267 = vmatprep.subr.bf16.mxu0 %v5198_v31  ;;  %v5950_v39 = vpop.f32.mrb[0].mxu1  ;;  %v419_v31 = vsub.s32 1, %v5958_v11  ;;  %v416_v33 = vrot.slane %v5961_v30, %v415_v29 }
 0x194   :  { %v5952_v40 = vpop.f32.mrb[1].mxu1 }
 0x195   :  { %v5954_v41 = vpop.f32.mrb[2].mxu1  ;;  %3503 = vmatpush1.bf16.msra.mxu1 %v5241_v37  ;;  %v5280_v37 = vld [vmem:[#allocation8 + $0xa8] ss:$16 sps:$4 sm:$0xff]  }
 0x196   :  { %2268 = vmatpush1.bf16.msra.mxu0 %v5196_v35  ;;  %v5956_v44 = vpop.f32.mrb[3].mxu1  ;;  %3504 = vmatprep.subr.bf16.mxu1 %v5249_v38  ;;  %v5282_v35 = vld [vmem:[#allocation8 + $0xac] ss:$16 sps:$4 sm:$0xff]   ;;  %v1948_v38 = vadd.f32 %v5950_v39, %v416_v33 }
 0x197   :  { %2269 = vmatprep.subr.bf16.mxu0 %v5201_v36  ;;  %v420_v36 = vrot.slane %v5961_v30, %v419_v31  ;;  %v5294_v39 = vld [vmem:[#allocation8 + $0xec] ss:$16 sps:$4 sm:$0xff]  }
 0x199   :  { %3505 = vmatpush1.bf16.msra.mxu1 %v5247_v43  ;;  %v1950_v43 = vadd.f32 %v5952_v40, %v420_v36  ;;  %v5292_v40 = vld [vmem:[#allocation8 + $0xe8] ss:$16 sps:$4 sm:$0xff]  }
 0x19a   :  { %2270 = vmatpush1.bf16.msra.mxu0 %v5199_v42  ;;  %3506 = vmatprep.subr.bf16.mxu1 %v5255_v46  ;;  %v5288_v42 = vld [vmem:[#allocation8 + $0xcc] ss:$16 sps:$4 sm:$0xff]   ;;  %v1952_v46 = vadd.f32 %v5954_v41, %v416_v33  ;;  %v5334_v33 = vld [vmem:[#allocation8 + $0x228] ss:$16 sps:$4 sm:$0xff]  }
 0x19b   :  { %2271 = vmatprep.subr.bf16.mxu0 %v5204_v45  ;;  %v5300_v41 = vld [vmem:[#allocation8 + $0x10c] ss:$16 sps:$4 sm:$0xff]  }
 0x19d   :  { %3507 = vmatpush1.bf16.msra.mxu1 %v5253_v51  ;;  %v1954_v51 = vadd.f32 %v5956_v44, %v420_v36  ;;  %v5306_v44 = vld [vmem:[#allocation8 + $0x12c] ss:$16 sps:$4 sm:$0xff]  }
 0x19e   :  { %2272 = vmatpush1.bf16.msra.mxu0 %v5202_v47  ;;  %3508 = vmatprep.subr.bf16.mxu1 %v5261_v52  ;;  %v5342_v36 = vld [vmem:[#allocation8 + $0x24c] ss:$16 sps:$4 sm:$0xff]  }
 0x19f   :  { %2273 = vmatprep.subr.bf16.mxu0 %v5207_v48 }
 0x1a1   :  { %3509 = vmatpush1.bf16.msra.mxu1 %v5259_v55 }
 0x1a2   :  { %2274 = vmatpush1.bf16.msra.mxu0 %v5205_v53  ;;  %3510 = vmatprep.subr.bf16.mxu1 %v5267_v56 }
 0x1a3   :  { %2275 = vmatprep.subr.bf16.mxu0 %v5210_v54  ;;  %v5286_v54 = vld [vmem:[#allocation8 + $0xc8] ss:$16 sps:$4 sm:$0xff]  }
 0x1a5   :  { %3511 = vmatpush1.bf16.msra.mxu1 %v5265_v59 }
 0x1a6   :  { %2276 = vmatpush1.bf16.msra.mxu0 %v5208_v57  ;;  %3512 = vmatprep.subr.bf16.mxu1 %v5273_v60 }
 0x1a7   :  { %2277 = vmatprep.subr.bf16.mxu0 %v5216_v58  ;;  %v5298_v58 = vld [vmem:[#allocation8 + $0x108] ss:$16 sps:$4 sm:$0xff]  }
 0x1a9   :  { %3513 = vmatpush1.bf16.msra.mxu1 %v5271_v63 }
 0x1aa   :  { %2278 = vmatpush1.bf16.msra.mxu0 %v5214_v61  ;;  %3514 = vmatprep.subr.bf16.mxu1 %v5279_v0  ;;  %v5304_v61 = vld [vmem:[#allocation8 + $0x128] ss:$16 sps:$4 sm:$0xff]  }
 0x1ab   :  { %2279 = vmatprep.subr.bf16.mxu0 %v5222_v62 }
 0x1ad   :  { %3515 = vmatpush1.bf16.msra.mxu1 %v5277_v2 }
 0x1ae   :  { %2280 = vmatpush1.bf16.msra.mxu0 %v5220_v1  ;;  %3516 = vmatprep.subr.bf16.mxu1 %v5285_v5  ;;  %v5309_v1 = vld [vmem:[#allocation8 + $0x14c] ss:$16 sps:$4 sm:$0xff]   ;;  %v5307_v5 = vld [vmem:[#allocation8 + $0x148] ss:$16 sps:$4 sm:$0xff]  }
 0x1af   :  { %2281 = vmatprep.subr.bf16.mxu0 %v5228_v3  ;;  %v5325_v3 = vld [vmem:[#allocation8 + $0x200] ss:$16 sps:$4 sm:$0xff]  }
 0x1b1   :  { %3517 = vmatpush1.bf16.msra.mxu1 %v5283_v8  ;;  %v5312_v8 = vld [vmem:[#allocation8 + $0x16c] ss:$16 sps:$4 sm:$0xff]  }
 0x1b2   :  { %2282 = vmatpush1.bf16.msra.mxu0 %v5226_v6  ;;  %3518 = vmatprep.subr.bf16.mxu1 %v5291_v10  ;;  %v5333_v6 = vld [vmem:[#allocation8 + $0x224] ss:$16 sps:$4 sm:$0xff]   ;;  %v5310_v10 = vld [vmem:[#allocation8 + $0x168] ss:$16 sps:$4 sm:$0xff]  }
 0x1b3   :  { %2283 = vmatprep.subr.bf16.mxu0 %v5234_v9  ;;  %v5331_v9 = vld [vmem:[#allocation8 + $0x220] ss:$16 sps:$4 sm:$0xff]  }
 0x1b5   :  { %3519 = vmatpush1.bf16.msra.mxu1 %v5289_v13  ;;  %v5315_v13 = vld [vmem:[#allocation8 + $0x18c] ss:$16 sps:$4 sm:$0xff]  }
 0x1b6   :  { %2284 = vmatpush1.bf16.msra.mxu0 %v5232_v12  ;;  %3520 = vmatprep.subr.bf16.mxu1 %v5297_v15  ;;  %v5339_v12 = vld [vmem:[#allocation8 + $0x244] ss:$16 sps:$4 sm:$0xff]   ;;  %v5313_v15 = vld [vmem:[#allocation8 + $0x188] ss:$16 sps:$4 sm:$0xff]  }
 0x1b7   :  { %2285 = vmatprep.subr.bf16.mxu0 %v5240_v14  ;;  %v5337_v14 = vld [vmem:[#allocation8 + $0x240] ss:$16 sps:$4 sm:$0xff]  }
 0x1b9   :  { %3521 = vmatpush1.bf16.msra.mxu1 %v5295_v17  ;;  %v5318_v17 = vld [vmem:[#allocation8 + $0x1ac] ss:$16 sps:$4 sm:$0xff]  }
 0x1ba   :  { %2286 = vmatpush1.bf16.msra.mxu0 %v5238_v16  ;;  %3522 = vmatprep.subr.bf16.mxu1 %v5303_v19  ;;  %v5345_v16 = vld [vmem:[#allocation8 + $0x264] ss:$16 sps:$4 sm:$0xff]   ;;  %v5316_v19 = vld [vmem:[#allocation8 + $0x1a8] ss:$16 sps:$4 sm:$0xff]  }
 0x1bb   :  { %2287 = vmatprep.subr.bf16.mxu0 %v5246_v18  ;;  %v5343_v18 = vld [vmem:[#allocation8 + $0x260] ss:$16 sps:$4 sm:$0xff]  }
 0x1bd   :  { %3523 = vmatpush1.bf16.msra.mxu1 %v5301_v21  ;;  %v5321_v21 = vld [vmem:[#allocation8 + $0x1cc] ss:$16 sps:$4 sm:$0xff]  }
 0x1be   :  { %2288 = vmatpush1.bf16.msra.mxu0 %v5244_v20  ;;  %3535 = vmatprep.subr.bf16.mxu1 %v5327_v23  ;;  %v5351_v20 = vld [vmem:[#allocation8 + $0x284] ss:$16 sps:$4 sm:$0xff]   ;;  %v5319_v23 = vld [vmem:[#allocation8 + $0x1c8] ss:$16 sps:$4 sm:$0xff]  }
 0x1bf   :  { %3621 = vmatprep.subr.bf16.mxu0 %v5252_v22  ;;  %v5349_v22 = vld [vmem:[#allocation8 + $0x280] ss:$16 sps:$4 sm:$0xff]  }
 0x1c1   :  { %2290 = vmatmul.mubr.bf16.vlgmr.msra.gmra.mrb[4].mxu0 %v5584_v26  ;;  %v5355_v26 = vld [vmem:[#allocation8 + $0x2a0] ss:$16 sps:$4 sm:$0xff]  }
 0x1c2   :  { %3622 = vmatpush1.bf16.msra.mxu0 %v5250_v24  ;;  %v5357_v24 = vld [vmem:[#allocation8 + $0x2a4] ss:$16 sps:$4 sm:$0xff]  }
 0x1c3   :  { %3623 = vmatprep.subr.bf16.mxu0 %v5258_v25  ;;  %v5324_v25 = vld [vmem:[#allocation8 + $0x1ec] ss:$16 sps:$4 sm:$0xff]  }
 0x1c6   :  { %3624 = vmatpush1.bf16.msra.mxu0 %v5256_v7  ;;  %v5322_v7 = vld [vmem:[#allocation8 + $0x1e8] ss:$16 sps:$4 sm:$0xff]  }
 0x1c7   :  { %3625 = vmatprep.subr.bf16.mxu0 %v5264_v27  ;;  %v5330_v27 = vld [vmem:[#allocation8 + $0x20c] ss:$16 sps:$4 sm:$0xff]  }
 0x1ca   :  { %3626 = vmatpush1.bf16.msra.mxu0 %v5262_v28  ;;  %v5361_v28 = vld [vmem:[#allocation8 + $0x2c0] ss:$16 sps:$4 sm:$0xff]  }
 0x1cb   :  { %3627 = vmatprep.subr.bf16.mxu0 %v5270_v50  ;;  %v5328_v50 = vld [vmem:[#allocation8 + $0x208] ss:$16 sps:$4 sm:$0xff]  }
 0x1ce   :  { %3628 = vmatpush1.bf16.msra.mxu0 %v5268_v49  ;;  %v5369_v49 = vld [vmem:[#allocation8 + $0x2e4] ss:$16 sps:$4 sm:$0xff]  }
 0x1cf   :  { %3629 = vmatprep.subr.bf16.mxu0 %v5276_v34  ;;  %v5336_v34 = vld [vmem:[#allocation8 + $0x22c] ss:$16 sps:$4 sm:$0xff]  }
 0x1d2   :  { %3630 = vmatpush1.bf16.msra.mxu0 %v5274_v32  ;;  %v5367_v32 = vld [vmem:[#allocation8 + $0x2e0] ss:$16 sps:$4 sm:$0xff]  }
 0x1d3   :  { %3631 = vmatprep.subr.bf16.mxu0 %v5282_v35  ;;  %v5375_v35 = vld [vmem:[#allocation8 + $0x304] ss:$16 sps:$4 sm:$0xff]  }
 0x1d4   :  { %v2033_v45 = vpop.f32.mrb[0].mxu0 }
 0x1d5   :  { %v4713_v47 = vadd.f32 %v2033_v45, %v1948_v38  ;;  %v2035_v48 = vpop.f32.mrb[1].mxu0  ;;  %v5340_v38 = vld [vmem:[#allocation8 + $0x248] ss:$16 sps:$4 sm:$0xff]   ;;  %v5379_v45 = vld [vmem:[#allocation8 + $0x320] ss:$16 sps:$4 sm:$0xff]  }
 0x1d6   :  { %v4715_v52 = vadd.f32 %v2035_v48, %v1950_v43  ;;  %v2037_v53 = vpop.f32.mrb[2].mxu0  ;;  %3632 = vmatpush1.bf16.msra.mxu0 %v5280_v37  ;;  %v5373_v37 = vld [vmem:[#allocation8 + $0x300] ss:$16 sps:$4 sm:$0xff]   ;;  %v5348_v43 = vld [vmem:[#allocation8 + $0x26c] ss:$16 sps:$4 sm:$0xff]  }
 0x1d7   :  { %5549 = vtanh.f32 %v4713_v47  ;;  %v4717_v55 = vadd.f32 %v2037_v53, %v1952_v46  ;;  %v2039_v56 = vpop.f32.mrb[3].mxu0  ;;  %3633 = vmatprep.subr.bf16.mxu0 %v5288_v42  ;;  %v5381_v42 = vld [vmem:[#allocation8 + $0x324] ss:$16 sps:$4 sm:$0xff]   ;;  %v5346_v46 = vld [vmem:[#allocation8 + $0x268] ss:$16 sps:$4 sm:$0xff]  }
 0x1d8   :  { %5551 = vtanh.f32 %v4715_v52  ;;  %v4719_v57 = vadd.f32 %v2039_v56, %v1954_v51  ;;  %v5387_v47 = vld [vmem:[#allocation8 + $0x344] ss:$16 sps:$4 sm:$0xff]   ;;  %v5354_v48 = vld [vmem:[#allocation8 + $0x28c] ss:$16 sps:$4 sm:$0xff]   ;;  %v5385_v51 = vld [vmem:[#allocation8 + $0x340] ss:$16 sps:$4 sm:$0xff]  }
 0x1d9   :  { %5553 = vtanh.f32 %v4717_v55  ;;  %v5352_v52 = vld [vmem:[#allocation8 + $0x288] ss:$16 sps:$4 sm:$0xff]   ;;  %v5393_v53 = vld [vmem:[#allocation8 + $0x364] ss:$16 sps:$4 sm:$0xff]   ;;  %v5391_v55 = vld [vmem:[#allocation8 + $0x360] ss:$16 sps:$4 sm:$0xff]  }
 0x1da   :  { %5555 = vtanh.f32 %v4719_v57  ;;  %3634 = vmatpush1.bf16.msra.mxu0 %v5286_v54  ;;  %v5360_v54 = vld [vmem:[#allocation8 + $0x2ac] ss:$16 sps:$4 sm:$0xff]   ;;  %v5358_v56 = vld [vmem:[#allocation8 + $0x2a8] ss:$16 sps:$4 sm:$0xff]  }
 0x1db   :  { %3635 = vmatprep.subr.bf16.mxu0 %v5294_v39  ;;  %v5399_v39 = vld [vmem:[#allocation8 + $0x384] ss:$16 sps:$4 sm:$0xff]   ;;  %v5366_v57 = vld [vmem:[#allocation8 + $0x2cc] ss:$16 sps:$4 sm:$0xff]  }
 0x1de   :  { %3636 = vmatpush1.bf16.msra.mxu0 %v5292_v40  ;;  %v5397_v40 = vld [vmem:[#allocation8 + $0x380] ss:$16 sps:$4 sm:$0xff]  }
 0x1df   :  { %3637 = vmatprep.subr.bf16.mxu0 %v5300_v41  ;;  %v5364_v41 = vld [vmem:[#allocation8 + $0x2c8] ss:$16 sps:$4 sm:$0xff]  }
 0x1e1   :  { %v5550_v59 = vpop.eup %5549 }
 0x1e2   :  { %v5552_v60 = vpop.eup %5551  ;;  %3638 = vmatpush1.bf16.msra.mxu0 %v5298_v58  ;;  %v5405_v58 = vld [vmem:[#allocation8 + $0x3a4] ss:$16 sps:$4 sm:$0xff]  }
 0x1e3   :  { %v5554_v62 = vpop.eup %5553  ;;  %3639 = vmatprep.subr.bf16.mxu0 %v5306_v44  ;;  %v5372_v44 = vld [vmem:[#allocation8 + $0x2ec] ss:$16 sps:$4 sm:$0xff]  }
 0x1e4   :  { %v5556_v63 = vpop.eup %5555  ;;  %v2312_v0 = vpack.c.bf16 %v5554_v62, %v5550_v59  ;;  %v5403_v59 = vld [vmem:[#allocation8 + $0x3a0] ss:$16 sps:$4 sm:$0xff]   ;;  %v5378_v62 = vld [vmem:[#allocation8 + $0x30c] ss:$16 sps:$4 sm:$0xff]  }
 0x1e5   :  { %v2313_v2 = vpack.c.bf16 %v5556_v63, %v5552_v60  ;;  %v5370_v60 = vld [vmem:[#allocation8 + $0x2e8] ss:$16 sps:$4 sm:$0xff]   ;;  %v5409_v63 = vld [vmem:[#allocation8 + $0x3c0] ss:$16 sps:$4 sm:$0xff]  }
 0x1e6   :  { %3640 = vmatpush1.bf16.msra.mxu0 %v5304_v61  ;;  %v5411_v61 = vld [vmem:[#allocation8 + $0x3c4] ss:$16 sps:$4 sm:$0xff]  }
 0x1e7   :  { %3524 = vmatprep.mubr.bf16.mxu1 %v2313_v2  ;;  %3653 = vmatprep.mubr.bf16.mxu0 %v2313_v2  ;;  %v5384_v2 = vld [vmem:[#allocation8 + $0x32c] ss:$16 sps:$4 sm:$0xff]  }
 0x1e8   :  { %3525 = vmatmul.mubr.bf16.vlgmr.msra.gmra.mrb[8].mxu1 %v2312_v0  ;;  %3641 = vmatprep.subr.bf16.mxu0 %v5309_v1  ;;  %v5417_v1 = vld [vmem:[#allocation8 + $0x3e4] ss:$16 sps:$4 sm:$0xff]  }
 0x1e9   :  { %3536 = vmatpush1.bf16.msra.mxu1 %v5325_v3  ;;  %v5415_v3 = vld [vmem:[#allocation8 + $0x3e0] ss:$16 sps:$4 sm:$0xff]  }
 0x1ea   :  { %3642 = vmatpush1.bf16.msra.mxu0 %v5307_v5  ;;  %3537 = vmatprep.subr.bf16.mxu1 %v5333_v6  ;;  %v5382_v5 = vld [vmem:[#allocation8 + $0x328] ss:$16 sps:$4 sm:$0xff]   ;;  %v5423_v6 = vld [vmem:[#allocation8 + $0x404] ss:$16 sps:$4 sm:$0xff]  }
 0x1eb   :  { %3643 = vmatprep.subr.bf16.mxu0 %v5312_v8  ;;  %v5390_v8 = vld [vmem:[#allocation8 + $0x34c] ss:$16 sps:$4 sm:$0xff]  }
 0x1ed   :  { %3538 = vmatpush1.bf16.msra.mxu1 %v5331_v9  ;;  %v5388_v9 = vld [vmem:[#allocation8 + $0x348] ss:$16 sps:$4 sm:$0xff]  }
 0x1ee   :  { %3644 = vmatpush1.bf16.msra.mxu0 %v5310_v10  ;;  %3539 = vmatprep.subr.bf16.mxu1 %v5339_v12  ;;  %v5396_v10 = vld [vmem:[#allocation8 + $0x36c] ss:$16 sps:$4 sm:$0xff]   ;;  %v5394_v12 = vld [vmem:[#allocation8 + $0x368] ss:$16 sps:$4 sm:$0xff]  }
 0x1ef   :  { %3645 = vmatprep.subr.bf16.mxu0 %v5315_v13  ;;  %v5402_v13 = vld [vmem:[#allocation8 + $0x38c] ss:$16 sps:$4 sm:$0xff]  }
 0x1f1   :  { %3540 = vmatpush1.bf16.msra.mxu1 %v5337_v14  ;;  %v5400_v14 = vld [vmem:[#allocation8 + $0x388] ss:$16 sps:$4 sm:$0xff]  }
 0x1f2   :  { %3646 = vmatpush1.bf16.msra.mxu0 %v5313_v15  ;;  %3541 = vmatprep.subr.bf16.mxu1 %v5345_v16  ;;  %v5408_v15 = vld [vmem:[#allocation8 + $0x3ac] ss:$16 sps:$4 sm:$0xff]   ;;  %v5406_v16 = vld [vmem:[#allocation8 + $0x3a8] ss:$16 sps:$4 sm:$0xff]  }
 0x1f3   :  { %3647 = vmatprep.subr.bf16.mxu0 %v5318_v17  ;;  %v5414_v17 = vld [vmem:[#allocation8 + $0x3cc] ss:$16 sps:$4 sm:$0xff]  }
 0x1f5   :  { %3542 = vmatpush1.bf16.msra.mxu1 %v5343_v18  ;;  %v5412_v18 = vld [vmem:[#allocation8 + $0x3c8] ss:$16 sps:$4 sm:$0xff]  }
 0x1f6   :  { %3648 = vmatpush1.bf16.msra.mxu0 %v5316_v19  ;;  %3543 = vmatprep.subr.bf16.mxu1 %v5351_v20  ;;  %v5420_v19 = vld [vmem:[#allocation8 + $0x3ec] ss:$16 sps:$4 sm:$0xff]   ;;  %v5418_v20 = vld [vmem:[#allocation8 + $0x3e8] ss:$16 sps:$4 sm:$0xff]  }
 0x1f7   :  { %3649 = vmatprep.subr.bf16.mxu0 %v5321_v21  ;;  %v5426_v21 = vld [vmem:[#allocation8 + $0x40c] ss:$16 sps:$4 sm:$0xff]  }
 0x1f9   :  { %3544 = vmatpush1.bf16.msra.mxu1 %v5349_v22  ;;  %v423_v22 = vsub.s32 2, %v5958_v11 }
 0x1fa   :  { %3650 = vmatpush1.bf16.msra.mxu0 %v5319_v23  ;;  %3545 = vmatprep.subr.bf16.mxu1 %v5357_v24  ;;  %v427_v23 = vsub.s32 3, %v5958_v11 }
 0x1fb   :  { %3651 = vmatprep.subr.bf16.mxu0 %v5324_v25  ;;  %v424_v24 = vrot.slane %v5961_v30, %v423_v22 }
 0x1fc   :  { %v428_v25 = vrot.slane %v5961_v30, %v427_v23 }
 0x1fd   :  { %3546 = vmatpush1.bf16.msra.mxu1 %v5355_v26 }
 0x1fe   :  { %3652 = vmatpush1.bf16.msra.mxu0 %v5322_v7  ;;  %3547 = vmatprep.subr.bf16.mxu1 %v5363_v4 }
 0x1ff   :  { %3664 = vmatprep.subr.bf16.mxu0 %v5330_v27 }
 0x201   :  { %3654 = vmatmul.mubr.bf16.vlgmr.msra.gmra.mrb[8].mxu0 %v2312_v0  ;;  %3548 = vmatpush1.bf16.msra.mxu1 %v5361_v28  ;;  %v5376_v0 = vld [vmem:[#allocation8 + $0x308] ss:$16 sps:$4 sm:$0xff]  }
 0x202   :  { %3665 = vmatpush1.bf16.msra.mxu0 %v5328_v50  ;;  %3549 = vmatprep.subr.bf16.mxu1 %v5369_v49 }
 0x203   :  { %3666 = vmatprep.subr.bf16.mxu0 %v5336_v34 }
 0x205   :  { %3550 = vmatpush1.bf16.msra.mxu1 %v5367_v32 }
 0x206   :  { %3667 = vmatpush1.bf16.msra.mxu0 %v5334_v33  ;;  %3551 = vmatprep.subr.bf16.mxu1 %v5375_v35 }
 0x207   :  { %3668 = vmatprep.subr.bf16.mxu0 %v5342_v36 }
 0x209   :  { %3552 = vmatpush1.bf16.msra.mxu1 %v5373_v37 }
 0x20a   :  { %3669 = vmatpush1.bf16.msra.mxu0 %v5340_v38  ;;  %3553 = vmatprep.subr.bf16.mxu1 %v5381_v42  ;;  %v5421_v42 = vld [vmem:[#allocation8 + $0x400] ss:$16 sps:$4 sm:$0xff]  }
 0x20b   :  { %3670 = vmatprep.subr.bf16.mxu0 %v5348_v43  ;;  %v5424_v43 = vld [vmem:[#allocation8 + $0x408] ss:$16 sps:$4 sm:$0xff]  }
 0x20d   :  { %3554 = vmatpush1.bf16.msra.mxu1 %v5379_v45  ;;  %v5429_v45 = vld [vmem:[#allocation8 + $0x424] ss:$16 sps:$4 sm:$0xff]  }
 0x20e   :  { %3671 = vmatpush1.bf16.msra.mxu0 %v5346_v46  ;;  %3555 = vmatprep.subr.bf16.mxu1 %v5387_v47  ;;  %v5432_v46 = vld [vmem:[#allocation8 + $0x42c] ss:$16 sps:$4 sm:$0xff]   ;;  %v5427_v47 = vld [vmem:[#allocation8 + $0x420] ss:$16 sps:$4 sm:$0xff]  }
 0x20f   :  { %3672 = vmatprep.subr.bf16.mxu0 %v5354_v48  ;;  %v5430_v48 = vld [vmem:[#allocation8 + $0x428] ss:$16 sps:$4 sm:$0xff]  }
 0x211   :  { %3556 = vmatpush1.bf16.msra.mxu1 %v5385_v51  ;;  %v5435_v51 = vld [vmem:[#allocation8 + $0x444] ss:$16 sps:$4 sm:$0xff]  }
 0x212   :  { %3673 = vmatpush1.bf16.msra.mxu0 %v5352_v52  ;;  %3557 = vmatprep.subr.bf16.mxu1 %v5393_v53  ;;  %v5438_v52 = vld [vmem:[#allocation8 + $0x44c] ss:$16 sps:$4 sm:$0xff]   ;;  %v5433_v53 = vld [vmem:[#allocation8 + $0x440] ss:$16 sps:$4 sm:$0xff]  }
 0x213   :  { %3674 = vmatprep.subr.bf16.mxu0 %v5360_v54  ;;  %v5436_v54 = vld [vmem:[#allocation8 + $0x448] ss:$16 sps:$4 sm:$0xff]  }
 0x215   :  { %3558 = vmatpush1.bf16.msra.mxu1 %v5391_v55  ;;  %v5441_v55 = vld [vmem:[#allocation8 + $0x464] ss:$16 sps:$4 sm:$0xff]  }
 0x216   :  { %3675 = vmatpush1.bf16.msra.mxu0 %v5358_v56  ;;  %3559 = vmatprep.subr.bf16.mxu1 %v5399_v39  ;;  %v5444_v56 = vld [vmem:[#allocation8 + $0x46c] ss:$16 sps:$4 sm:$0xff]   ;;  %v5439_v39 = vld [vmem:[#allocation8 + $0x460] ss:$16 sps:$4 sm:$0xff]  }
 0x217   :  { %3676 = vmatprep.subr.bf16.mxu0 %v5366_v57  ;;  %v5442_v57 = vld [vmem:[#allocation8 + $0x468] ss:$16 sps:$4 sm:$0xff]  }
 0x219   :  { %3560 = vmatpush1.bf16.msra.mxu1 %v5397_v40  ;;  %v5447_v40 = vld [vmem:[#allocation8 + $0x484] ss:$16 sps:$4 sm:$0xff]  }
 0x21a   :  { %3677 = vmatpush1.bf16.msra.mxu0 %v5364_v41  ;;  %3561 = vmatprep.subr.bf16.mxu1 %v5405_v58  ;;  %v5450_v41 = vld [vmem:[#allocation8 + $0x48c] ss:$16 sps:$4 sm:$0xff]   ;;  %v5445_v58 = vld [vmem:[#allocation8 + $0x480] ss:$16 sps:$4 sm:$0xff]  }
 0x21b   :  { %3678 = vmatprep.subr.bf16.mxu0 %v5372_v44  ;;  %v5448_v44 = vld [vmem:[#allocation8 + $0x488] ss:$16 sps:$4 sm:$0xff]  }
 0x21d   :  { %3562 = vmatpush1.bf16.msra.mxu1 %v5403_v59  ;;  %v5453_v59 = vld [vmem:[#allocation8 + $0x4a4] ss:$16 sps:$4 sm:$0xff]  }
 0x21e   :  { %3679 = vmatpush1.bf16.msra.mxu0 %v5370_v60  ;;  %3563 = vmatprep.subr.bf16.mxu1 %v5411_v61  ;;  %v5456_v60 = vld [vmem:[#allocation8 + $0x4ac] ss:$16 sps:$4 sm:$0xff]   ;;  %v5451_v61 = vld [vmem:[#allocation8 + $0x4a0] ss:$16 sps:$4 sm:$0xff]  }
 0x21f   :  { %3680 = vmatprep.subr.bf16.mxu0 %v5378_v62  ;;  %v5454_v62 = vld [vmem:[#allocation8 + $0x4a8] ss:$16 sps:$4 sm:$0xff]  }
 0x221   :  { %3564 = vmatpush1.bf16.msra.mxu1 %v5409_v63  ;;  %v5459_v63 = vld [vmem:[#allocation8 + $0x4c4] ss:$16 sps:$4 sm:$0xff]  }
 0x222   :  { %3681 = vmatpush1.bf16.msra.mxu0 %v5376_v0  ;;  %3565 = vmatprep.subr.bf16.mxu1 %v5417_v1  ;;  %v5462_v0 = vld [vmem:[#allocation8 + $0x4cc] ss:$16 sps:$4 sm:$0xff]   ;;  %v5457_v1 = vld [vmem:[#allocation8 + $0x4c0] ss:$16 sps:$4 sm:$0xff]  }
 0x223   :  { %3682 = vmatprep.subr.bf16.mxu0 %v5384_v2  ;;  %v5460_v2 = vld [vmem:[#allocation8 + $0x4c8] ss:$16 sps:$4 sm:$0xff]  }
 0x225   :  { %3566 = vmatpush1.bf16.msra.mxu1 %v5415_v3  ;;  %v5465_v3 = vld [vmem:[#allocation8 + $0x4e4] ss:$16 sps:$4 sm:$0xff]  }
 0x226   :  { %3683 = vmatpush1.bf16.msra.mxu0 %v5382_v5  ;;  %3578 = vmatprep.subr.bf16.mxu1 %v5423_v6  ;;  %v5468_v5 = vld [vmem:[#allocation8 + $0x4ec] ss:$16 sps:$4 sm:$0xff]   ;;  %v5463_v6 = vld [vmem:[#allocation8 + $0x4e0] ss:$16 sps:$4 sm:$0xff]  }
 0x227   :  { %3684 = vmatprep.subr.bf16.mxu0 %v5390_v8  ;;  %v5466_v8 = vld [vmem:[#allocation8 + $0x4e8] ss:$16 sps:$4 sm:$0xff]  }
 0x22a   :  { %3685 = vmatpush1.bf16.msra.mxu0 %v5388_v9  ;;  %v5471_v9 = vld [vmem:[#allocation8 + $0x504] ss:$16 sps:$4 sm:$0xff]  }
 0x22b   :  { %3686 = vmatprep.subr.bf16.mxu0 %v5396_v10  ;;  %v5474_v10 = vld [vmem:[#allocation8 + $0x50c] ss:$16 sps:$4 sm:$0xff]  }
 0x22e   :  { %3687 = vmatpush1.bf16.msra.mxu0 %v5394_v12  ;;  %v5469_v12 = vld [vmem:[#allocation8 + $0x500] ss:$16 sps:$4 sm:$0xff]  }
 0x22f   :  { %3688 = vmatprep.subr.bf16.mxu0 %v5402_v13  ;;  %v5472_v13 = vld [vmem:[#allocation8 + $0x508] ss:$16 sps:$4 sm:$0xff]  }
 0x232   :  { %3689 = vmatpush1.bf16.msra.mxu0 %v5400_v14  ;;  %v5477_v14 = vld [vmem:[#allocation8 + $0x524] ss:$16 sps:$4 sm:$0xff]  }
 0x233   :  { %3690 = vmatprep.subr.bf16.mxu0 %v5408_v15  ;;  %v5480_v15 = vld [vmem:[#allocation8 + $0x52c] ss:$16 sps:$4 sm:$0xff]  }
 0x236   :  { %3691 = vmatpush1.bf16.msra.mxu0 %v5406_v16  ;;  %v5475_v16 = vld [vmem:[#allocation8 + $0x520] ss:$16 sps:$4 sm:$0xff]  }
 0x237   :  { %3692 = vmatprep.subr.bf16.mxu0 %v5414_v17  ;;  %v5478_v17 = vld [vmem:[#allocation8 + $0x528] ss:$16 sps:$4 sm:$0xff]  }
 0x23a   :  { %3693 = vmatpush1.bf16.msra.mxu0 %v5412_v18  ;;  %v5483_v18 = vld [vmem:[#allocation8 + $0x544] ss:$16 sps:$4 sm:$0xff]  }
 0x23b   :  { %3694 = vmatprep.subr.bf16.mxu0 %v5420_v19  ;;  %v5486_v19 = vld [vmem:[#allocation8 + $0x54c] ss:$16 sps:$4 sm:$0xff]  }
 0x23e   :  { %3695 = vmatpush1.bf16.msra.mxu0 %v5418_v20  ;;  %v5481_v20 = vld [vmem:[#allocation8 + $0x540] ss:$16 sps:$4 sm:$0xff]  }
 0x23f   :  { %3707 = vmatprep.subr.bf16.mxu0 %v5426_v21  ;;  %v5484_v21 = vld [vmem:[#allocation8 + $0x548] ss:$16 sps:$4 sm:$0xff]  }
 0x253   :  { %v2162_v26 = vpop.f32.mrb[4].mxu1 }
 0x254   :  { %v4720_v7 = vadd.f32 %v2162_v26, %v424_v24  ;;  %v2164_v4 = vpop.f32.mrb[5].mxu1  ;;  %v5492_v26 = vld [vmem:[#allocation8 + $0x56c] ss:$16 sps:$4 sm:$0xff]  }
 0x255   :  { %v4721_v27 = vadd.f32 %v2164_v4, %v428_v25  ;;  %v2166_v28 = vpop.f32.mrb[6].mxu1 }
 0x256   :  { %5557 = vtanh.f32 %v4720_v7  ;;  %v4722_v50 = vadd.f32 %v2166_v28, %v424_v24  ;;  %v2168_v49 = vpop.f32.mrb[7].mxu1  ;;  %v431_v24 = vsub.s32 4, %v5958_v11  ;;  %v435_v7 = vsub.s32 5, %v5958_v11  ;;  %v5490_v28 = vld [vmem:[#allocation8 + $0x568] ss:$16 sps:$4 sm:$0xff]  }
 0x257   :  { %5559 = vtanh.f32 %v4721_v27  ;;  %v4723_v34 = vadd.f32 %v2168_v49, %v428_v25  ;;  %v5489_v25 = vld [vmem:[#allocation8 + $0x564] ss:$16 sps:$4 sm:$0xff]   ;;  %v5487_v27 = vld [vmem:[#allocation8 + $0x560] ss:$16 sps:$4 sm:$0xff]  }
 0x258   :  { %5561 = vtanh.f32 %v4722_v50  ;;  %v432_v4 = vrot.slane %v5961_v30, %v431_v24  ;;  %v436_v50 = vrot.slane %v5961_v30, %v435_v7  ;;  %v5495_v49 = vld [vmem:[#allocation8 + $0x584] ss:$16 sps:$4 sm:$0xff]  }
 0x259   :  { %5563 = vtanh.f32 %v4723_v34  ;;  %v5498_v34 = vld [vmem:[#allocation8 + $0x58c] ss:$16 sps:$4 sm:$0xff]  }
 0x260   :  { %v5558_v32 = vpop.eup %5557 }
 0x261   :  { %v5560_v33 = vpop.eup %5559 }
 0x262   :  { %v5562_v35 = vpop.eup %5561 }
 0x263   :  { %v5564_v36 = vpop.eup %5563  ;;  %v2314_v37 = vpack.c.bf16 %v5562_v35, %v5558_v32 }
 0x264   :  { %v2315_v38 = vpack.c.bf16 %v5564_v36, %v5560_v33  ;;  %v5493_v36 = vld [vmem:[#allocation8 + $0x580] ss:$16 sps:$4 sm:$0xff]  }
 0x266   :  { %3567 = vmatprep.mubr.bf16.mxu1 %v2315_v38  ;;  %3696 = vmatprep.mubr.bf16.mxu0 %v2315_v38 }
 0x267   :  { %3568 = vmatmul.mubr.bf16.vlgmr.msra.gmra.mrb[8].mxu1 %v2314_v37  ;;  %3697 = vmatmul.mubr.bf16.vlgmr.msra.gmra.mrb[8].mxu0 %v2314_v37  ;;  %v5496_v37 = vld [vmem:[#allocation8 + $0x588] ss:$16 sps:$4 sm:$0xff]  }
 0x268   :  { %3579 = vmatpush1.bf16.msra.mxu1 %v5421_v42  ;;  %3708 = vmatpush1.bf16.msra.mxu0 %v5424_v43  ;;  %v5501_v43 = vld [vmem:[#allocation8 + $0x5a4] ss:$16 sps:$4 sm:$0xff]  }
 0x269   :  { %3580 = vmatprep.subr.bf16.mxu1 %v5429_v45  ;;  %3709 = vmatprep.subr.bf16.mxu0 %v5432_v46  ;;  %v5504_v45 = vld [vmem:[#allocation8 + $0x5ac] ss:$16 sps:$4 sm:$0xff]  }
 0x26c   :  { %3581 = vmatpush1.bf16.msra.mxu1 %v5427_v47  ;;  %3710 = vmatpush1.bf16.msra.mxu0 %v5430_v48  ;;  %v5499_v48 = vld [vmem:[#allocation8 + $0x5a0] ss:$16 sps:$4 sm:$0xff]  }
 0x26d   :  { %3582 = vmatprep.subr.bf16.mxu1 %v5435_v51  ;;  %3711 = vmatprep.subr.bf16.mxu0 %v5438_v52  ;;  %v5502_v51 = vld [vmem:[#allocation8 + $0x5a8] ss:$16 sps:$4 sm:$0xff]   ;;  %v5507_v52 = vld [vmem:[#allocation8 + $0x5c4] ss:$16 sps:$4 sm:$0xff]  }
 0x270   :  { %3583 = vmatpush1.bf16.msra.mxu1 %v5433_v53  ;;  %3712 = vmatpush1.bf16.msra.mxu0 %v5436_v54  ;;  %v5510_v53 = vld [vmem:[#allocation8 + $0x5cc] ss:$16 sps:$4 sm:$0xff]   ;;  %v5505_v54 = vld [vmem:[#allocation8 + $0x5c0] ss:$16 sps:$4 sm:$0xff]  }
 0x271   :  { %3584 = vmatprep.subr.bf16.mxu1 %v5441_v55  ;;  %3713 = vmatprep.subr.bf16.mxu0 %v5444_v56  ;;  %v5508_v55 = vld [vmem:[#allocation8 + $0x5c8] ss:$16 sps:$4 sm:$0xff]   ;;  %v5513_v56 = vld [vmem:[#allocation8 + $0x5e4] ss:$16 sps:$4 sm:$0xff]  }
 0x274   :  { %3585 = vmatpush1.bf16.msra.mxu1 %v5439_v39  ;;  %3714 = vmatpush1.bf16.msra.mxu0 %v5442_v57  ;;  %v5516_v39 = vld [vmem:[#allocation8 + $0x5ec] ss:$16 sps:$4 sm:$0xff]  }
 0x275   :  { %3586 = vmatprep.subr.bf16.mxu1 %v5447_v40  ;;  %3715 = vmatprep.subr.bf16.mxu0 %v5450_v41  ;;  %v5511_v40 = vld [vmem:[#allocation8 + $0x5e0] ss:$16 sps:$4 sm:$0xff]   ;;  %v5514_v41 = vld [vmem:[#allocation8 + $0x5e8] ss:$16 sps:$4 sm:$0xff]  }
 0x278   :  { %3587 = vmatpush1.bf16.msra.mxu1 %v5445_v58  ;;  %3716 = vmatpush1.bf16.msra.mxu0 %v5448_v44  ;;  %v5517_v44 = vld [vmem:[#allocation11 + $0x40] sm:$0xff]  }
 0x279   :  { %3588 = vmatprep.subr.bf16.mxu1 %v5453_v59  ;;  %3717 = vmatprep.subr.bf16.mxu0 %v5456_v60 }
 0x27c   :  { %3589 = vmatpush1.bf16.msra.mxu1 %v5451_v61  ;;  %3718 = vmatpush1.bf16.msra.mxu0 %v5454_v62 }
 0x27d   :  { %3590 = vmatprep.subr.bf16.mxu1 %v5459_v63  ;;  %3719 = vmatprep.subr.bf16.mxu0 %v5462_v0  ;;  %v5518_v63 = vld [vmem:[#allocation11] sm:$0xff]   ;;  %v5519_v0 = vld [vmem:[#allocation11 + $0x48] sm:$0xff]  }
 0x280   :  { %3591 = vmatpush1.bf16.msra.mxu1 %v5457_v1  ;;  %3720 = vmatpush1.bf16.msra.mxu0 %v5460_v2  ;;  %v5520_v1 = vld [vmem:[#allocation11 + $0x8] sm:$0xff]   ;;  %v5521_v2 = vld [vmem:[#allocation11 + $0x50] sm:$0xff]  }
 0x281   :  { %3592 = vmatprep.subr.bf16.mxu1 %v5465_v3  ;;  %3721 = vmatprep.subr.bf16.mxu0 %v5468_v5  ;;  %v5522_v3 = vld [vmem:[#allocation11 + $0x10] sm:$0xff]   ;;  %v5523_v5 = vld [vmem:[#allocation11 + $0x58] sm:$0xff]  }
 0x284   :  { %3593 = vmatpush1.bf16.msra.mxu1 %v5463_v6  ;;  %3722 = vmatpush1.bf16.msra.mxu0 %v5466_v8  ;;  %v5524_v6 = vld [vmem:[#allocation11 + $0x18] sm:$0xff]   ;;  %v5525_v8 = vld [vmem:[#allocation11 + $0x60] sm:$0xff]  }
 0x285   :  { %3594 = vmatprep.subr.bf16.mxu1 %v5471_v9  ;;  %3723 = vmatprep.subr.bf16.mxu0 %v5474_v10  ;;  %v5526_v9 = vld [vmem:[#allocation11 + $0x20] sm:$0xff]   ;;  %v5527_v10 = vld [vmem:[#allocation11 + $0x68] sm:$0xff]  }
 0x288   :  { %3595 = vmatpush1.bf16.msra.mxu1 %v5469_v12  ;;  %3724 = vmatpush1.bf16.msra.mxu0 %v5472_v13  ;;  %v5528_v12 = vld [vmem:[#allocation11 + $0x28] sm:$0xff]   ;;  %v5529_v13 = vld [vmem:[#allocation11 + $0x70] sm:$0xff]  }
 0x289   :  { %3596 = vmatprep.subr.bf16.mxu1 %v5477_v14  ;;  %3725 = vmatprep.subr.bf16.mxu0 %v5480_v15  ;;  %v5530_v14 = vld [vmem:[#allocation11 + $0x30] sm:$0xff]   ;;  %v5531_v15 = vld [vmem:[#allocation11 + $0x78] sm:$0xff]  }
 0x28c   :  { %3597 = vmatpush1.bf16.msra.mxu1 %v5475_v16  ;;  %3726 = vmatpush1.bf16.msra.mxu0 %v5478_v17  ;;  %v5532_v16 = vld [vmem:[#allocation11 + $0x38] sm:$0xff]   ;;  %v5533_v17 = vld [vmem:[#allocation11 + $0xc0] sm:$0xff]  }
 0x28d   :  { %3598 = vmatprep.subr.bf16.mxu1 %v5483_v18  ;;  %3727 = vmatprep.subr.bf16.mxu0 %v5486_v19  ;;  %v2510_v18 = vld [vmem:[#allocation10] sm:$0xf] }
 0x28e   :  { %v2515_v19 = vrot.slane %v2510_v18, %v415_v29  ;;  %v2527_v24 = vrot.slane %v2510_v18, %v427_v23 }
 0x290   :  { %3599 = vmatpush1.bf16.msra.mxu1 %v5481_v20  ;;  %3728 = vmatpush1.bf16.msra.mxu0 %v5484_v21  ;;  %v2523_v20 = vrot.slane %v2510_v18, %v423_v22  ;;  %v2519_v21 = vrot.slane %v2510_v18, %v419_v31 }
 0x291   :  { %3600 = vmatprep.subr.bf16.mxu1 %v5489_v25  ;;  %3729 = vmatprep.subr.bf16.mxu0 %v5492_v26 }
 0x294   :  { %v2291_v32 = vpop.f32.mrb[4].mxu0  ;;  %3601 = vmatpush1.bf16.msra.mxu1 %v5487_v27  ;;  %3730 = vmatpush1.bf16.msra.mxu0 %v5490_v28 }
 0x295   :  { %v4724_v33 = vadd.f32 %v2291_v32, %v432_v4  ;;  %v2293_v35 = vpop.f32.mrb[5].mxu0  ;;  %3602 = vmatprep.subr.bf16.mxu1 %v5495_v49  ;;  %3731 = vmatprep.subr.bf16.mxu0 %v5498_v34 }
 0x296   :  { %v4725_v38 = vadd.f32 %v2293_v35, %v436_v50  ;;  %v2295_v42 = vpop.f32.mrb[6].mxu0 }
 0x297   :  { %5565 = vtanh.f32 %v4724_v33  ;;  %v4726_v46 = vadd.f32 %v2295_v42, %v432_v4  ;;  %v2297_v47 = vpop.f32.mrb[7].mxu0 }
 0x298   :  { %5567 = vtanh.f32 %v4725_v38  ;;  %v4727_v30 = vadd.f32 %v2297_v47, %v436_v50  ;;  %3603 = vmatpush1.bf16.msra.mxu1 %v5493_v36  ;;  %3732 = vmatpush1.bf16.msra.mxu0 %v5496_v37 }
 0x299   :  { %5569 = vtanh.f32 %v4726_v46  ;;  %3604 = vmatprep.subr.bf16.mxu1 %v5501_v43  ;;  %3733 = vmatprep.subr.bf16.mxu0 %v5504_v45 }
 0x29a   :  { %5571 = vtanh.f32 %v4727_v30 }
 0x29c   :  { %3605 = vmatpush1.bf16.msra.mxu1 %v5499_v48  ;;  %3734 = vmatpush1.bf16.msra.mxu0 %v5502_v51 }
 0x29d   :  { %3606 = vmatprep.subr.bf16.mxu1 %v5507_v52  ;;  %3735 = vmatprep.subr.bf16.mxu0 %v5510_v53  ;;  %v5534_v52 = vld [vmem:[#allocation11 + $0x80] sm:$0xff]   ;;  %v5535_v53 = vld [vmem:[#allocation11 + $0xc8] sm:$0xff]  }
 0x2a0   :  { %3607 = vmatpush1.bf16.msra.mxu1 %v5505_v54  ;;  %3736 = vmatpush1.bf16.msra.mxu0 %v5508_v55  ;;  %v5536_v54 = vld [vmem:[#allocation11 + $0x88] sm:$0xff]   ;;  %v5537_v55 = vld [vmem:[#allocation11 + $0xd0] sm:$0xff]  }
 0x2a1   :  { %v5566_v57 = vpop.eup %5565  ;;  %3608 = vmatprep.subr.bf16.mxu1 %v5513_v56  ;;  %3737 = vmatprep.subr.bf16.mxu0 %v5516_v39  ;;  %v5538_v56 = vld [vmem:[#allocation11 + $0x90] sm:$0xff]   ;;  %v5539_v39 = vld [vmem:[#allocation11 + $0xd8] sm:$0xff]  }
 0x2a2   :  { %v5568_v58 = vpop.eup %5567 }
 0x2a3   :  { %v5570_v59 = vpop.eup %5569 }
 0x2a4   :  { %v5572_v60 = vpop.eup %5571  ;;  %v2316_v61 = vpack.c.bf16 %v5570_v59, %v5566_v57  ;;  %3609 = vmatpush1.bf16.msra.mxu1 %v5511_v40  ;;  %3738 = vmatpush1.bf16.msra.mxu0 %v5514_v41  ;;  %v5540_v57 = vld [vmem:[#allocation11 + $0x98] sm:$0xff]   ;;  %v5541_v40 = vld [vmem:[#allocation11 + $0xe0] sm:$0xff]   ;;  %v5545_v59 = vld [vmem:[#allocation11 + $0xf0] sm:$0xff]  }
 0x2a5   :  { %v2317_v62 = vpack.c.bf16 %v5572_v60, %v5568_v58  ;;  %4668 = vmatprep.subr.bf16.mxu1 %v5517_v44  ;;  %v5542_v41 = vld [vmem:[#allocation11 + $0xa0] sm:$0xff]   ;;  %v5543_v58 = vld [vmem:[#allocation11 + $0xe8] sm:$0xff]   ;;  %v5546_v60 = vld [vmem:[#allocation11 + $0xb0] sm:$0xff]  }
 0x2a6   :  { %v5544_v44 = vld [vmem:[#allocation11 + $0xa8] sm:$0xff]  }
 0x2a7   :  { %3610 = vmatprep.mubr.bf16.mxu1 %v2317_v62  ;;  %3739 = vmatprep.mubr.bf16.mxu0 %v2317_v62  ;;  %v5548_v62 = vld [vmem:[#allocation11 + $0xb8] sm:$0xff]  }
 0x2a8   :  { %3611 = vmatmul.mubr.bf16.vlgmr.msra.gmra.mrb[8].mxu1 %v2316_v61  ;;  %3740 = vmatmul.mubr.bf16.vlgmr.msra.gmra.mrb[8].mxu0 %v2316_v61  ;;  %v5547_v61 = vld [vmem:[#allocation11 + $0xf8] sm:$0xff]  }
 0x2a9   :  { %4669 = vmatpush3.bf16.msra.mxu1 %v5518_v63 }
 0x2aa   :  { %4670 = vmatprep.subr.bf16.mxu1 %v5519_v0 }
 0x2ad   :  { %4671 = vmatpush3.bf16.msra.mxu1 %v5520_v1 }
 0x2ae   :  { %4672 = vmatprep.subr.bf16.mxu1 %v5521_v2 }
 0x2b1   :  { %4673 = vmatpush3.bf16.msra.mxu1 %v5522_v3 }
 0x2b2   :  { %4674 = vmatprep.subr.bf16.mxu1 %v5523_v5 }
 0x2b5   :  { %4675 = vmatpush3.bf16.msra.mxu1 %v5524_v6  ;;  %v4635_v6 = vld [vmem:[#allocation13] ss:$0 sm:$0xff] }
 0x2b6   :  { %4676 = vmatprep.subr.bf16.mxu1 %v5525_v8 }
 0x2b9   :  { %4677 = vmatpush3.bf16.msra.mxu1 %v5526_v9 }
 0x2ba   :  { %4678 = vmatprep.subr.bf16.mxu1 %v5527_v10 }
 0x2bd   :  { %4679 = vmatpush3.bf16.msra.mxu1 %v5528_v12 }
 0x2be   :  { %4680 = vmatprep.subr.bf16.mxu1 %v5529_v13 }
 0x2c1   :  { %4681 = vmatpush3.bf16.msra.mxu1 %v5530_v14 }
 0x2c2   :  { %4682 = vmatprep.subr.bf16.mxu1 %v5531_v15 }
 0x2c5   :  { %4683 = vmatpush3.bf16.msra.mxu1 %v5532_v16 }
 0x2c6   :  { %4690 = vmatprep.subr.bf16.mxu1 %v5533_v17 }
 0x37b   :  { %v3612_v25 = vpop.f32.mrb[8].mxu1  ;;  %v3741_v26 = vpop.f32.mrb[8].mxu0 }
 0x37c   :  { %v4728_v7 = vadd.f32 %v3612_v25, %v2515_v19  ;;  %v4732_v4 = vadd.f32 %v3741_v26, %v2523_v20  ;;  %v3614_v27 = vpop.f32.mrb[9].mxu1  ;;  %v3743_v28 = vpop.f32.mrb[9].mxu0 }
 0x37d   :  { %v4729_v50 = vadd.f32 %v3614_v27, %v2519_v21  ;;  %v4733_v49 = vadd.f32 %v3743_v28, %v2527_v24  ;;  %v3616_v34 = vpop.f32.mrb[10].mxu1  ;;  %v3745_v32 = vpop.f32.mrb[10].mxu0 }
 0x37e   :  { %v4730_v29 = vadd.f32 %v3616_v34, %v2515_v19  ;;  %v4734_v33 = vadd.f32 %v3745_v32, %v2523_v20  ;;  %v3618_v35 = vpop.f32.mrb[11].mxu1  ;;  %v3747_v22 = vpop.f32.mrb[11].mxu0  ;;  %v3750_v31 = vmax.f32 %v4728_v7, 0.0  ;;  %v3752_v38 = vmax.f32 %v4732_v4, 0.0 }
 0x37f   :  { %v4731_v36 = vadd.f32 %v3618_v35, %v2519_v21  ;;  %v4735_v37 = vadd.f32 %v3747_v22, %v2527_v24  ;;  %v3751_v42 = vmax.f32 %v4729_v50, 0.0  ;;  %v3753_v43 = vmax.f32 %v4733_v49, 0.0 }
 0x380   :  { %v3754_v11 = vmax.f32 %v4730_v29, 0.0  ;;  %v3756_v23 = vmax.f32 %v4734_v33, 0.0 }
 0x381   :  { %v3755_v45 = vmax.f32 %v4731_v36, 0.0  ;;  %v3757_v46 = vmax.f32 %v4735_v37, 0.0 }
 0x382   :  { %v3758_v47 = vpack.c.bf16 %v3754_v11, %v3750_v31  ;;  %v3760_v30 = vpack.c.bf16 %v3756_v23, %v3752_v38 }
 0x383   :  { %v3759_v48 = vpack.c.bf16 %v3755_v45, %v3751_v42  ;;  %v3761_v51 = vpack.c.bf16 %v3757_v46, %v3753_v43 }
 0x385   :  { %4057 = vmatprep.mubr.bf16.mxu1 %v3759_v48 }
 0x386   :  { %4058 = vmatmul.mubr.bf16.vlgmr.msra.gmra.mrb[12].mxu1 %v3758_v47 }
 0x387   :  { %4691 = vmatpush3.bf16.msra.mxu1 %v5534_v52  ;;  %4098 = vmatprep.mubr.bf16.mxu1 %v3761_v51 }
 0x388   :  { %4692 = vmatprep.subr.bf16.mxu1 %v5535_v53 }
 0x38b   :  { %4693 = vmatpush3.bf16.msra.mxu1 %v5536_v54 }
 0x38c   :  { %4694 = vmatprep.subr.bf16.mxu1 %v5537_v55 }
 0x38f   :  { %4695 = vmatpush3.bf16.msra.mxu1 %v5538_v56 }
 0x390   :  { %4696 = vmatprep.subr.bf16.mxu1 %v5539_v39 }
 0x393   :  { %4697 = vmatpush3.bf16.msra.mxu1 %v5540_v57 }
 0x394   :  { %4698 = vmatprep.subr.bf16.mxu1 %v5541_v40 }
 0x397   :  { %4699 = vmatpush3.bf16.msra.mxu1 %v5542_v41 }
 0x398   :  { %4700 = vmatprep.subr.bf16.mxu1 %v5543_v58 }
 0x39b   :  { %4701 = vmatpush3.bf16.msra.mxu1 %v5544_v44 }
 0x39c   :  { %4702 = vmatprep.subr.bf16.mxu1 %v5545_v59 }
 0x39f   :  { %4703 = vmatpush3.bf16.msra.mxu1 %v5546_v60 }
 0x3a0   :  { %4704 = vmatprep.subr.bf16.mxu1 %v5547_v61 }
 0x3a3   :  { %4705 = vmatpush3.bf16.msra.mxu1 %v5548_v62 }
 0x3a6   :  { %4099 = vmatmul.mubr.bf16.vlgmr.msra.gmra.mrb[16].mxu1 %v3760_v30 }
 0x459   :  { %v4684_v63 = vpop.f32.mrb[12].mxu1 }
 0x45a   :  { %v4685_v0 = vpop.f32.mrb[13].mxu1 }
 0x45b   :  { %v4686_v1 = vadd.f32 %v4685_v0, %v4684_v63  ;;  %v4687_v2 = vpop.f32.mrb[14].mxu1 }
 0x45c   :  { %v4688_v3 = vpop.f32.mrb[15].mxu1 }
 0x45d   :  { %v4689_v5 = vadd.f32 %v4688_v3, %v4687_v2  ;;  %v4060_v10 = vadd.f32 %v4686_v1, %v4635_v6 }
 0x45f   :  { %v4063_v15 = vadd.f32 %v4689_v5, %v4635_v6 }
 0x479   :  { %v4706_v8 = vpop.f32.mrb[16].mxu1 }
 0x47a   :  { %v4707_v9 = vpop.f32.mrb[17].mxu1 }
 0x47b   :  { %v4708_v12 = vadd.f32 %v4707_v9, %v4706_v8  ;;  %v4709_v13 = vpop.f32.mrb[18].mxu1 }
 0x47c   :  { %v4710_v14 = vpop.f32.mrb[19].mxu1 }
 0x47d   :  { %v4711_v16 = vadd.f32 %v4710_v14, %v4709_v13  ;;  %v4101_v17 = vadd.f32 %v4708_v12, %v4060_v10 }
 0x47f   :  { %4107 = vmax.xlane.f32.xlu0 %v4101_v17  ;;  %v4104_v18 = vadd.f32 %v4711_v16, %v4063_v15 }
 0x483   :  { %4109 = vmax.xlane.f32.xlu0 %v4104_v18 }
 0x50c   :  { %v4108_v19 = vpop.xlane.xlu0 %4107 }
 0x50d   :  { %v4111_v20 = vsub.f32 %v4101_v17, %v4108_v19 }
 0x50f   :  { %v4113_v21 = vmul.f32 1.442695, %v4111_v20 }
 0x510   :  { %v4110_v24 = vpop.xlane.xlu0 %4109 }
 0x511   :  { %v4112_v25 = vsub.f32 %v4104_v18, %v4110_v24  ;;  %5573 = vpow2.f32 %v4113_v21 }
 0x513   :  { %v4115_v26 = vmul.f32 1.442695, %v4112_v25 }
 0x515   :  { %5575 = vpow2.f32 %v4115_v26 }
 0x51b   :  { %v5574_v7 = vpop.eup %5573 }
 0x51c   :  { %4117 = vadd.xlane.f32.xlu1 %v5574_v7 }
 0x51f   :  { %v5576_v4 = vpop.eup %5575 }
 0x520   :  { %4119 = vadd.xlane.f32.xlu1 %v5576_v4 }
 0x5a9   :  { %v4118_v27 = vpop.xlane.xlu1 %4117 }
 0x5aa   :  { %5577 = vlog2.f32 %v4118_v27 }
 0x5ad   :  { %v4120_v28 = vpop.xlane.xlu1 %4119 }
 0x5ae   :  { %5579 = vlog2.f32 %v4120_v28 }
 0x5b4   :  { %v5578_v50 = vpop.eup %5577 }
 0x5b5   :  { %v4122_v49 = vmul.f32 0.6931472, %v5578_v50 }
 0x5b7   :  { %v4125_v34 = vsub.f32 %v4111_v20, %v4122_v49 }
 0x5b8   :  { %v5580_v32 = vpop.eup %5579 }
 0x5b9   :  { %4127 = vst [vmem:[#allocation14] sm:$0xff] %v4125_v34  ;;  %v4124_v29 = vmul.f32 0.6931472, %v5580_v32 }
 0x5bb   :  { %v4126_v33 = vsub.f32 %v4112_v25, %v4124_v29 }
 0x5bd   :  { %4128 = vst [vmem:[#allocation14 + $0x8] sm:$0xff] %v4126_v33 }
 0x5be   :  { %5750 = shalt.err (!%p5747_p4)
}
 0x5bf   :  { %s5751_s14 = scalar_lea.hbm %s6013_s7, 256 }
 0x5c0   :  { %p5752_p5 = scmp.ne.s32.totalorder %s6013_s7, %s5751_s14  ;;  %p5755_p6 = scmp.lt.u32.totalorder %s5751_s14, %s6013_s7 }
 0x5c2   :  { %p5757_p7 = pnand %p5755_p6, %p5752_p5 }
 0x5c4   :  { %5760 = shalt.err (!%p5757_p7)
}
 0x5c5   :  { %s5785_s22 = smov 128   ;;  %s5786_s24 = smov 8  }
 0x5c6   :  { %4140 = dma.vmem_to_hbm [thread:$0]  %s4135_s3, 256, %s6013_s7, [#allocation4], %s5785_s22, %s5785_s22, %s5786_s24  }
 0x5c7   :  { %5769 = dma.done.wait [#allocation4], 256  }
 0x5c8   :  { %5770 = vsyncadd [#allocation4], 4294967040 }
 0x5c9   :  { %4144 = vsyncpa [#allocation3], 1 }
 0x5ca   :  { %4145 = vsyncpa [#allocation6], 1 }
 0x5cb   :  { %4146 = vsyncpa [#allocation9], 1 }
 0x5cc   :  { %4147 = vsyncpa [#allocation12], 1 }
 0x5cd   :  { %4148 = vsyncpa [#allocation4], 1 }

</bundles_post_ra>
